<compile_context>
chip_gen: v5e
topology: v5e:2x2
jax: 0.10.0
libtpu: 0.0.40
codegen_flags: <defaults>
</compile_context>

<pallas_src>
import functools
import math

import jax
import jax.numpy as jnp
import numpy as np
from jax import lax
from jax.experimental import pallas as pl
from jax.experimental.pallas import tpu as pltpu


def _styled_conv_kernel(x_ref, style_ref, noise_ref, w_ref, mw_ref, mb_ref,
                        ab_ref, nw_ref, o_ref, s_ref, d_ref, xs_ref, *,
                        k, w_padded, lin_scale, bt, l_out):
    """One grid step: `bt` batch elements x one spatial row-tile.

    x_ref    : (bt, 1, in_c, l_in)   width-padded, row-flattened input slab
    style_ref: (bt, 1, style_dim)
    noise_ref: (bt, 1, 1, l_out)     width-padded, row-flattened noise tile (f32)
    w_ref    : (k*k, out_c, in_c)    conv weight (fan-in scale folded in), tap-major
    mw_ref   : (in_c, style_dim)     modulation EqualLinear weight
    mb_ref   : (in_c, 1)             modulation bias
    ab_ref   : (out_c, 1)            FusedLeakyReLU bias
    nw_ref   : (1,) in SMEM          NoiseInjection scalar weight
    o_ref    : (bt, out_c, l_out)
    s_ref    : (in_c, bt)  VMEM scratch: per-batch style modulation (channel-major)
    d_ref    : (out_c, bt) VMEM scratch: per-batch demodulation coefficients
    xs_ref   : (in_c, l_in) VMEM scratch: style-scaled input slab (one batch at a time)
    """
    kk = k * k

    # ---- style modulation + demod coefficients, hoisted: once per batch tile ----
    @pl.when(pl.program_id(1) == 0)
    def _():
        style = style_ref[:, 0].astype(jnp.float32)                    # (bt, style_dim)
        # s[i, b] = sum_d mw[i, d] * style[b, d]   (channel-major: no transposes)
        s = lax.dot_general(mw_ref[...], style, (((1,), (1,)), ((), ())),
                            preferred_element_type=jnp.float32)
        s = s * lin_scale + mb_ref[...]                                 # (in_c, bt)
        s_ref[...] = s
        w0 = w_ref[...].astype(jnp.float32)                             # (kk, out_c, in_c)
        wsq = jnp.sum(w0 * w0, axis=0)                                  # (out_c, in_c)
        d = jnp.dot(wsq, s * s, preferred_element_type=jnp.float32)     # (out_c, bt)
        d_ref[...] = lax.rsqrt(d + 1e-8)

    # ---- conv as k*k shifted matmuls + demod + noise injection + fused leaky relu ----
    nw = nw_ref[0]                                   # scalar from SMEM
    sqrt2 = jnp.float32(math.sqrt(2.0))
    for b in range(bt):
        # per-input-channel style scaling (== modulating the weight; conv is linear)
        xs_ref[...] = (x_ref[b, 0].astype(jnp.float32)
                       * s_ref[:, b:b + 1]).astype(xs_ref.dtype)
        acc = None
        for t in range(kk):
            off = (t // k) * w_padded + (t % k)      # dy*Wpad + dx (static)
            contrib = jnp.dot(w_ref[t], xs_ref[:, off:off + l_out],
                              preferred_element_type=jnp.float32)       # (out_c, l_out)
            acc = contrib if acc is None else acc + contrib
        out = acc * d_ref[:, b:b + 1]                # demodulate:   * (out_c, 1)
        out = out + nw * noise_ref[b, 0]             # noise:        + (1, l_out)
        out = out + ab_ref[...]                      # act bias:     + (out_c, 1)
        out = jnp.where(out >= 0.0, out, 0.2 * out) * sqrt2
        o_ref[b] = out.astype(o_ref.dtype)


def _divisors(n):
    return [d for d in range(1, n + 1) if n % d == 0]


def styled_conv(x, style, noise, params, *, kernel_size,
                compute_dtype=jnp.bfloat16, out_dtype=None,
                vmem_budget_bytes=8 * 1024 * 1024):
    """StyledConv forward (fused ModulatedConv2d, no up/downsample) in one Pallas call."""
    B, in_c, H, W = x.shape
    out_c = params["weight"].shape[1]
    k = kernel_size
    kk = k * k
    p = k // 2
    style_dim = style.shape[1]
    out_dtype = out_dtype or x.dtype

    Wp = W + 2 * p                  # width including conv padding (lane-layout trick)
    halo = 2 * p + 1                # extra rows per slab (+1 guard row for the last shift)
    cbytes = jnp.dtype(compute_dtype).itemsize
    obytes = jnp.dtype(out_dtype).itemsize

    # ---- pick batch-tile (bt) and row-tile (th) sizes from a small VMEM budget ----
    def tile_bytes(bt_, th_):
        rows = th_ + halo
        x_blk = bt_ * in_c * rows * Wp * cbytes      # streamed input slab
        nz_blk = bt_ * th_ * Wp * 4                  # noise tile (f32)
        o_blk = bt_ * out_c * th_ * Wp * obytes      # output tile
        xs_scr = in_c * rows * Wp * cbytes           # scaled-x scratch
        acc = out_c * th_ * Wp * 4                   # f32 accumulator temp
        return 2 * (x_blk + nz_blk + o_blk) + xs_scr + acc   # x2 ~ double buffering

    bt = max(d for d in _divisors(B)
             if tile_bytes(d, H) <= vmem_budget_bytes or d == 1)
    th = H
    if bt == 1 and tile_bytes(1, H) > vmem_budget_bytes:
        # Mosaic (8,128) rule: a partial lane-dim output block must be 128-aligned.
        cands = [d for d in _divisors(H) if d == H or (d * Wp) % 128 == 0]
        fitting = [d for d in cands if tile_bytes(1, d) <= vmem_budget_bytes]
        th = max(fitting) if fitting else min(cands)
    n_bt, n_ht = B // bt, H // th
    l_in = (th + halo) * Wp
    l_out = th * Wp

    # ---- glue (plain JAX): zero-pad + row-flatten; NO im2col, x materialized ~1x ----
    x_pad = jnp.pad(x, ((0, 0), (0, 0), (p, p + 1), (p, p))).astype(compute_dtype)
    if n_ht == 1:
        x_tiles = x_pad.reshape(B, 1, in_c, l_in)
    else:  # overlapping row slabs (halo rows duplicated only)
        x_tiles = jnp.stack(
            [x_pad[:, :, t * th: t * th + th + halo] for t in range(n_ht)],
            axis=1).reshape(B, n_ht, in_c, l_in)

    noise_p = jnp.pad(noise.astype(jnp.float32), ((0, 0), (0, 0), (0, 0), (0, 2 * p)))
    noise_tiles = noise_p.reshape(B, n_ht, 1, l_out)

    lin_scale = 1.0 / math.sqrt(style_dim)           # EqualLinear scale (lr_mul = 1)
    conv_scale = 1.0 / math.sqrt(in_c * k * k)       # ModulatedConv2d fan-in scale

    # tap-major, fan-in-scaled base weight: w_taps[dy*k+dx, o, i] = scale*weight[0,o,i,dy,dx]
    w_taps = jnp.transpose(conv_scale * params["weight"][0],
                           (2, 3, 0, 1)).reshape(kk, out_c, in_c).astype(compute_dtype)
    mw = params["mod_weight"].astype(jnp.float32)                      # (in_c, style_dim)
    mb = params["mod_bias"].reshape(in_c, 1).astype(jnp.float32)
    ab = params["act_bias"].reshape(out_c, 1).astype(jnp.float32)
    nw = params["noise_weight"].reshape(1).astype(jnp.float32)
    style3 = style.reshape(B, 1, style_dim).astype(jnp.float32)

    kernel = functools.partial(_styled_conv_kernel, k=k, w_padded=Wp,
                               lin_scale=lin_scale, bt=bt, l_out=l_out)

    grid_spec = pltpu.PrefetchScalarGridSpec(
        num_scalar_prefetch=0,
        grid=(n_bt, n_ht),
        in_specs=[
            pl.BlockSpec((bt, 1, in_c, l_in), lambda i, j: (i, j, 0, 0)),   # x slab
            pl.BlockSpec((bt, 1, style_dim), lambda i, j: (i, 0, 0)),       # style
            pl.BlockSpec((bt, 1, 1, l_out), lambda i, j: (i, j, 0, 0)),     # noise tile
            pl.BlockSpec((kk, out_c, in_c), lambda i, j: (0, 0, 0)),        # conv weight
            pl.BlockSpec((in_c, style_dim), lambda i, j: (0, 0)),           # modulation weight
            pl.BlockSpec((in_c, 1), lambda i, j: (0, 0)),                   # modulation bias
            pl.BlockSpec((out_c, 1), lambda i, j: (0, 0)),                  # activation bias
            pl.BlockSpec(memory_space=pltpu.MemorySpace.SMEM),              # noise weight scalar
        ],
        out_specs=pl.BlockSpec((bt, out_c, l_out), lambda i, j: (i, 0, j)),
        scratch_shapes=[
            pltpu.VMEM((in_c, bt), jnp.float32),        # style modulation s
            pltpu.VMEM((out_c, bt), jnp.float32),       # demod coefficients
            pltpu.VMEM((in_c, l_in), compute_dtype),    # style-scaled input slab
        ],
    )

    out_flat = pl.pallas_call(
        kernel,
        out_shape=jax.ShapeDtypeStruct((B, out_c, H * Wp), out_dtype),
        grid_spec=grid_spec,
        compiler_params=pltpu.CompilerParams(
            dimension_semantics=("parallel", "arbitrary"),
            vmem_limit_bytes=48 * 1024 * 1024),
    )(x_tiles, style3, noise_tiles, w_taps, mw, mb, ab, nw)

    # crop away the width-padding columns that were computed as throwaway lanes
    return out_flat.reshape(B, out_c, H, Wp)[..., :W]


def ref_styled_conv(x, style, noise, params, k):
    """Pure NumPy (float64) reference mirroring the PyTorch forward."""
    x = np.asarray(x, np.float64)
    style = np.asarray(style, np.float64)
    noise = np.asarray(noise, np.float64)
    w0 = np.asarray(params["weight"], np.float64)[0]               # (out_c, in_c, k, k)
    mw = np.asarray(params["mod_weight"], np.float64)
    mb = np.asarray(params["mod_bias"], np.float64)
    nw = float(np.asarray(params["noise_weight"]).reshape(()))
    ab = np.asarray(params["act_bias"], np.float64)

    B, in_c, H, W = x.shape
    out_c = w0.shape[0]
    lin_scale = 1.0 / math.sqrt(style.shape[1])
    conv_scale = 1.0 / math.sqrt(in_c * k * k)

    s = style @ (mw * lin_scale).T + mb                            # (B, in_c)
    w = conv_scale * w0[None] * s[:, None, :, None, None]          # (B, out_c, in_c, k, k)
    demod = 1.0 / np.sqrt((w ** 2).sum(axis=(2, 3, 4)) + 1e-8)
    w = w * demod[:, :, None, None, None]

    p = k // 2
    xp = np.pad(x, ((0, 0), (0, 0), (p, p), (p, p)))
    out = np.zeros((B, out_c, H, W))
    for dy in range(k):
        for dx in range(k):
            patch = xp[:, :, dy:dy + H, dx:dx + W]                 # (B, in_c, H, W)
            out += np.einsum('boi,bihw->bohw', w[:, :, :, dy, dx], patch)

    out = out + nw * noise
    out = out + ab.reshape(1, out_c, 1, 1)
    out = np.where(out >= 0, out, 0.2 * out) * math.sqrt(2.0)
    return out


if __name__ == "__main__":
    B, in_c, out_c, k, style_dim, H, W = 2, 4, 8, 3, 32, 16, 16

    key = jax.random.PRNGKey(0)
    k1, k2, k3, k4, k5, k6 = jax.random.split(key, 6)

    x = jax.random.normal(k1, (B, in_c, H, W), dtype=jnp.float32)
    style = jax.random.normal(k2, (B, style_dim), dtype=jnp.float32)
    # TODO(synk): NoiseInjection draws torch N(0,1) noise when noise is None; we pass
    # noise explicitly so the run is deterministic (in-kernel pltpu.prng_* would not
    # match torch's RNG stream anyway).
    noise = jax.random.normal(k3, (B, 1, H, W), dtype=jnp.float32)

    params = {
        # ModulatedConv2d.weight: randn(1, out_c, in_c, k, k)
        "weight": jax.random.normal(k4, (1, out_c, in_c, k, k), dtype=jnp.float32),
        # EqualLinear(style_dim, in_c): weight randn(in_c, style_dim), bias_init=1
        "mod_weight": jax.random.normal(k5, (in_c, style_dim), dtype=jnp.float32),
        "mod_bias": jnp.ones((in_c,), dtype=jnp.float32),
        # NoiseInjection.weight / FusedLeakyReLU.bias (non-zero to exercise the paths)
        "noise_weight": jnp.full((1,), 0.25, dtype=jnp.float32),
        "act_bias": 0.1 * jax.random.normal(k6, (out_c,), dtype=jnp.float32),
    }

    # f32 path (near-bit-accurate check) and default bf16-MXU path
    out_f32 = styled_conv(x, style, noise, params, kernel_size=k,
                          compute_dtype=jnp.float32)
    out_bf16 = styled_conv(x, style, noise, params, kernel_size=k)
    out_f32, out_bf16 = jax.block_until_ready((out_f32, out_bf16))

    ref = ref_styled_conv(x, style, noise, params, k)
    np.testing.assert_allclose(np.asarray(out_f32), ref, rtol=2e-3, atol=2e-3)
    np.testing.assert_allclose(np.asarray(out_bf16), ref, rtol=5e-2, atol=5e-2)

    print("KERNEL_OK")
</pallas_src>

<mosaic_0001>
module attributes {stable_mosaic.version = 11 : i64} {
  func.func @_styled_conv_kernel(%arg0: i32, %arg1: i32, %arg2: memref<2x1x4x342xf32, #tpu.memory_space<vmem>>, %arg3: memref<2x1x32xf32, #tpu.memory_space<vmem>>, %arg4: memref<2x1x1x288xf32, #tpu.memory_space<vmem>>, %arg5: memref<9x8x4xf32, #tpu.memory_space<vmem>>, %arg6: memref<4x32xf32, #tpu.memory_space<vmem>>, %arg7: memref<4x1xf32, #tpu.memory_space<vmem>>, %arg8: memref<8x1xf32, #tpu.memory_space<vmem>>, %arg9: memref<1xf32, #tpu.memory_space<smem>>, %arg10: memref<2x8x288xf32, #tpu.memory_space<vmem>>, %arg11: memref<4x2xf32, #tpu.memory_space<vmem>>, %arg12: memref<8x2xf32, #tpu.memory_space<vmem>>, %arg13: memref<4x342xf32, #tpu.memory_space<vmem>>) attributes {dimension_semantics = [#tpu.dimension_semantics<parallel>, #tpu.dimension_semantics<arbitrary>], iteration_bounds = array<i64: 1, 1>, scalar_prefetch = 0 : i64, scratch_operands = 3 : i64, tpu.core_type = #tpu.core_type<tc>, window_params = [{transform_indices = @transform_0, window_bounds = array<i64: 2, 1, 4, 342>}, {transform_indices = @transform_1, window_bounds = array<i64: 2, 1, 32>}, {transform_indices = @transform_2, window_bounds = array<i64: 2, 1, 1, 288>}, {pipeline_mode = #tpu.pipeline_mode<synchronous>, transform_indices = @transform_3, window_bounds = array<i64: 9, 8, 4>}, {pipeline_mode = #tpu.pipeline_mode<synchronous>, transform_indices = @transform_4, window_bounds = array<i64: 4, 32>}, {pipeline_mode = #tpu.pipeline_mode<synchronous>, transform_indices = @transform_5, window_bounds = array<i64: 4, 1>}, {pipeline_mode = #tpu.pipeline_mode<synchronous>, transform_indices = @transform_6, window_bounds = array<i64: 8, 1>}, {transform_indices = @transform_7, window_bounds = array<i64: 1>}, {transform_indices = @transform_8, window_bounds = array<i64: 2, 8, 288>}]} {
    %c0_i32 = arith.constant 0 : i32
    %0 = arith.cmpi eq, %arg1, %c0_i32 : i32
    %1 = arith.extui %0 : i1 to i32
    %c0_i32_0 = arith.constant 0 : i32
    %2 = arith.cmpi ne, %1, %c0_i32_0 : i32
    scf.if %2 {
      %c0_138 = arith.constant 0 : index
      %c0_139 = arith.constant 0 : index
      %c0_140 = arith.constant 0 : index
      %148 = vector.load %arg3[%c0_138, %c0_139, %c0_140] : memref<2x1x32xf32, #tpu.memory_space<vmem>>, vector<2x1x32xf32>
      %149 = vector.shape_cast %148 : vector<2x1x32xf32> to vector<2x32xf32>
      %c0_141 = arith.constant 0 : index
      %c0_142 = arith.constant 0 : index
      %150 = vector.load %arg6[%c0_141, %c0_142] : memref<4x32xf32, #tpu.memory_space<vmem>>, vector<4x32xf32>
      %cst_143 = arith.constant dense<0.000000e+00> : vector<4x2xf32>
      %151 = tpu.matmul %150, %149, %cst_143 {dimension_numbers = #tpu.dot_dimension_numbers<[1], [1], [0], [0], [0, 0, 1, 0], [], []>} : vector<4x32xf32>, vector<2x32xf32>, vector<4x2xf32> -> vector<4x2xf32>
      %cst_144 = arith.constant 0.176776692 : f32
      %152 = vector.broadcast %cst_144 : f32 to vector<4x2xf32>
      %153 = arith.mulf %151, %152 : vector<4x2xf32>
      %c0_145 = arith.constant 0 : index
      %c0_146 = arith.constant 0 : index
      %154 = vector.load %arg7[%c0_145, %c0_146] : memref<4x1xf32, #tpu.memory_space<vmem>>, vector<4x1xf32>
      %155 = vector.broadcast %154 : vector<4x1xf32> to vector<4x2xf32>
      %156 = arith.addf %153, %155 : vector<4x2xf32>
      %c0_147 = arith.constant 0 : index
      %c0_148 = arith.constant 0 : index
      %157 = vector.load %arg11[%c0_147, %c0_148] : memref<4x2xf32, #tpu.memory_space<vmem>>, vector<4x2xf32>
      tpu.vector_store %arg11[%c0_147, %c0_148], %156 {strides = array<i32>} : memref<4x2xf32, #tpu.memory_space<vmem>>, vector<4x2xf32>,
      %c0_149 = arith.constant 0 : index
      %c0_150 = arith.constant 0 : index
      %c0_151 = arith.constant 0 : index
      %158 = vector.load %arg5[%c0_149, %c0_150, %c0_151] : memref<9x8x4xf32, #tpu.memory_space<vmem>>, vector<9x8x4xf32>
      %159 = arith.mulf %158, %158 : vector<9x8x4xf32>
      %cst_152 = arith.constant dense<0.000000e+00> : vector<8x4xf32>
      %160 = vector.multi_reduction <add>, %159, %cst_152 [0] : vector<9x8x4xf32> to vector<8x4xf32>
      %161 = arith.mulf %156, %156 : vector<4x2xf32>
      %cst_153 = arith.constant dense<0.000000e+00> : vector<8x2xf32>
      %162 = tpu.matmul %160, %161, %cst_153 {dimension_numbers = #tpu.dot_dimension_numbers<[1], [0], [0], [1], [0, 0, 1, 1], [], []>} : vector<8x4xf32>, vector<4x2xf32>, vector<8x2xf32> -> vector<8x2xf32>
      %cst_154 = arith.constant 9.99999993E-9 : f32
      %163 = vector.broadcast %cst_154 : f32 to vector<8x2xf32>
      %164 = arith.addf %162, %163 : vector<8x2xf32>
      %165 = math.rsqrt %164 : vector<8x2xf32>
      %c0_155 = arith.constant 0 : index
      %c0_156 = arith.constant 0 : index
      %166 = vector.load %arg12[%c0_155, %c0_156] : memref<8x2xf32, #tpu.memory_space<vmem>>, vector<8x2xf32>
      tpu.vector_store %arg12[%c0_155, %c0_156], %165 {strides = array<i32>} : memref<8x2xf32, #tpu.memory_space<vmem>>, vector<8x2xf32>,
    } else {
    }
    %c0 = arith.constant 0 : index
    %3 = memref.load %arg9[%c0] : memref<1xf32, #tpu.memory_space<smem>>
    %c0_1 = arith.constant 0 : index
    %c0_2 = arith.constant 0 : index
    %c0_3 = arith.constant 0 : index
    %c0_4 = arith.constant 0 : index
    %4 = vector.load %arg2[%c0_1, %c0_2, %c0_3, %c0_4] : memref<2x1x4x342xf32, #tpu.memory_space<vmem>>, vector<1x1x4x342xf32>
    %5 = vector.shape_cast %4 : vector<1x1x4x342xf32> to vector<4x342xf32>
    %c0_5 = arith.constant 0 : index
    %c0_6 = arith.constant 0 : index
    %6 = vector.load %arg11[%c0_5, %c0_6] : memref<4x2xf32, #tpu.memory_space<vmem>>, vector<4x1xf32>
    %7 = vector.broadcast %6 : vector<4x1xf32> to vector<4x342xf32>
    %8 = arith.mulf %5, %7 : vector<4x342xf32>
    %c0_7 = arith.constant 0 : index
    %c0_8 = arith.constant 0 : index
    %9 = vector.load %arg13[%c0_7, %c0_8] : memref<4x342xf32, #tpu.memory_space<vmem>>, vector<4x342xf32>
    tpu.vector_store %arg13[%c0_7, %c0_8], %8 {strides = array<i32>} : memref<4x342xf32, #tpu.memory_space<vmem>>, vector<4x342xf32>,
    %c0_9 = arith.constant 0 : index
    %c0_10 = arith.constant 0 : index
    %c0_11 = arith.constant 0 : index
    %10 = vector.load %arg5[%c0_9, %c0_10, %c0_11] : memref<9x8x4xf32, #tpu.memory_space<vmem>>, vector<1x8x4xf32>
    %11 = vector.shape_cast %10 : vector<1x8x4xf32> to vector<8x4xf32>
    %c0_12 = arith.constant 0 : index
    %c0_13 = arith.constant 0 : index
    %12 = vector.load %arg13[%c0_12, %c0_13] : memref<4x342xf32, #tpu.memory_space<vmem>>, vector<4x288xf32>
    %cst = arith.constant dense<0.000000e+00> : vector<8x288xf32>
    %13 = tpu.matmul %11, %12, %cst {dimension_numbers = #tpu.dot_dimension_numbers<[1], [0], [0], [1], [0, 0, 1, 1], [], []>} : vector<8x4xf32>, vector<4x288xf32>, vector<8x288xf32> -> vector<8x288xf32>
    %c1 = arith.constant 1 : index
    %c0_14 = arith.constant 0 : index
    %c0_15 = arith.constant 0 : index
    %14 = vector.load %arg5[%c1, %c0_14, %c0_15] : memref<9x8x4xf32, #tpu.memory_space<vmem>>, vector<1x8x4xf32>
    %15 = vector.shape_cast %14 : vector<1x8x4xf32> to vector<8x4xf32>
    %c0_16 = arith.constant 0 : index
    %c1_17 = arith.constant 1 : index
    %16 = vector.load %arg13[%c0_16, %c1_17] : memref<4x342xf32, #tpu.memory_space<vmem>>, vector<4x288xf32>
    %cst_18 = arith.constant dense<0.000000e+00> : vector<8x288xf32>
    %17 = tpu.matmul %15, %16, %cst_18 {dimension_numbers = #tpu.dot_dimension_numbers<[1], [0], [0], [1], [0, 0, 1, 1], [], []>} : vector<8x4xf32>, vector<4x288xf32>, vector<8x288xf32> -> vector<8x288xf32>
    %18 = arith.addf %13, %17 : vector<8x288xf32>
    %c2 = arith.constant 2 : index
    %c0_19 = arith.constant 0 : index
    %c0_20 = arith.constant 0 : index
    %19 = vector.load %arg5[%c2, %c0_19, %c0_20] : memref<9x8x4xf32, #tpu.memory_space<vmem>>, vector<1x8x4xf32>
    %20 = vector.shape_cast %19 : vector<1x8x4xf32> to vector<8x4xf32>
    %c0_21 = arith.constant 0 : index
    %c2_22 = arith.constant 2 : index
    %21 = vector.load %arg13[%c0_21, %c2_22] : memref<4x342xf32, #tpu.memory_space<vmem>>, vector<4x288xf32>
    %cst_23 = arith.constant dense<0.000000e+00> : vector<8x288xf32>
    %22 = tpu.matmul %20, %21, %cst_23 {dimension_numbers = #tpu.dot_dimension_numbers<[1], [0], [0], [1], [0, 0, 1, 1], [], []>} : vector<8x4xf32>, vector<4x288xf32>, vector<8x288xf32> -> vector<8x288xf32>
    %23 = arith.addf %18, %22 : vector<8x288xf32>
    %c3 = arith.constant 3 : index
    %c0_24 = arith.constant 0 : index
    %c0_25 = arith.constant 0 : index
    %24 = vector.load %arg5[%c3, %c0_24, %c0_25] : memref<9x8x4xf32, #tpu.memory_space<vmem>>, vector<1x8x4xf32>
    %25 = vector.shape_cast %24 : vector<1x8x4xf32> to vector<8x4xf32>
    %c0_26 = arith.constant 0 : index
    %c18 = arith.constant 18 : index
    %26 = vector.load %arg13[%c0_26, %c18] : memref<4x342xf32, #tpu.memory_space<vmem>>, vector<4x288xf32>
    %cst_27 = arith.constant dense<0.000000e+00> : vector<8x288xf32>
    %27 = tpu.matmul %25, %26, %cst_27 {dimension_numbers = #tpu.dot_dimension_numbers<[1], [0], [0], [1], [0, 0, 1, 1], [], []>} : vector<8x4xf32>, vector<4x288xf32>, vector<8x288xf32> -> vector<8x288xf32>
    %28 = arith.addf %23, %27 : vector<8x288xf32>
    %c4 = arith.constant 4 : index
    %c0_28 = arith.constant 0 : index
    %c0_29 = arith.constant 0 : index
    %29 = vector.load %arg5[%c4, %c0_28, %c0_29] : memref<9x8x4xf32, #tpu.memory_space<vmem>>, vector<1x8x4xf32>
    %30 = vector.shape_cast %29 : vector<1x8x4xf32> to vector<8x4xf32>
    %c0_30 = arith.constant 0 : index
    %c19 = arith.constant 19 : index
    %31 = vector.load %arg13[%c0_30, %c19] : memref<4x342xf32, #tpu.memory_space<vmem>>, vector<4x288xf32>
    %cst_31 = arith.constant dense<0.000000e+00> : vector<8x288xf32>
    %32 = tpu.matmul %30, %31, %cst_31 {dimension_numbers = #tpu.dot_dimension_numbers<[1], [0], [0], [1], [0, 0, 1, 1], [], []>} : vector<8x4xf32>, vector<4x288xf32>, vector<8x288xf32> -> vector<8x288xf32>
    %33 = arith.addf %28, %32 : vector<8x288xf32>
    %c5 = arith.constant 5 : index
    %c0_32 = arith.constant 0 : index
    %c0_33 = arith.constant 0 : index
    %34 = vector.load %arg5[%c5, %c0_32, %c0_33] : memref<9x8x4xf32, #tpu.memory_space<vmem>>, vector<1x8x4xf32>
    %35 = vector.shape_cast %34 : vector<1x8x4xf32> to vector<8x4xf32>
    %c0_34 = arith.constant 0 : index
    %c20 = arith.constant 20 : index
    %36 = vector.load %arg13[%c0_34, %c20] : memref<4x342xf32, #tpu.memory_space<vmem>>, vector<4x288xf32>
    %cst_35 = arith.constant dense<0.000000e+00> : vector<8x288xf32>
    %37 = tpu.matmul %35, %36, %cst_35 {dimension_numbers = #tpu.dot_dimension_numbers<[1], [0], [0], [1], [0, 0, 1, 1], [], []>} : vector<8x4xf32>, vector<4x288xf32>, vector<8x288xf32> -> vector<8x288xf32>
    %38 = arith.addf %33, %37 : vector<8x288xf32>
    %c6 = arith.constant 6 : index
    %c0_36 = arith.constant 0 : index
    %c0_37 = arith.constant 0 : index
    %39 = vector.load %arg5[%c6, %c0_36, %c0_37] : memref<9x8x4xf32, #tpu.memory_space<vmem>>, vector<1x8x4xf32>
    %40 = vector.shape_cast %39 : vector<1x8x4xf32> to vector<8x4xf32>
    %c0_38 = arith.constant 0 : index
    %c36 = arith.constant 36 : index
    %41 = vector.load %arg13[%c0_38, %c36] : memref<4x342xf32, #tpu.memory_space<vmem>>, vector<4x288xf32>
    %cst_39 = arith.constant dense<0.000000e+00> : vector<8x288xf32>
    %42 = tpu.matmul %40, %41, %cst_39 {dimension_numbers = #tpu.dot_dimension_numbers<[1], [0], [0], [1], [0, 0, 1, 1], [], []>} : vector<8x4xf32>, vector<4x288xf32>, vector<8x288xf32> -> vector<8x288xf32>
    %43 = arith.addf %38, %42 : vector<8x288xf32>
    %c7 = arith.constant 7 : index
    %c0_40 = arith.constant 0 : index
    %c0_41 = arith.constant 0 : index
    %44 = vector.load %arg5[%c7, %c0_40, %c0_41] : memref<9x8x4xf32, #tpu.memory_space<vmem>>, vector<1x8x4xf32>
    %45 = vector.shape_cast %44 : vector<1x8x4xf32> to vector<8x4xf32>
    %c0_42 = arith.constant 0 : index
    %c37 = arith.constant 37 : index
    %46 = vector.load %arg13[%c0_42, %c37] : memref<4x342xf32, #tpu.memory_space<vmem>>, vector<4x288xf32>
    %cst_43 = arith.constant dense<0.000000e+00> : vector<8x288xf32>
    %47 = tpu.matmul %45, %46, %cst_43 {dimension_numbers = #tpu.dot_dimension_numbers<[1], [0], [0], [1], [0, 0, 1, 1], [], []>} : vector<8x4xf32>, vector<4x288xf32>, vector<8x288xf32> -> vector<8x288xf32>
    %48 = arith.addf %43, %47 : vector<8x288xf32>
    %c8 = arith.constant 8 : index
    %c0_44 = arith.constant 0 : index
    %c0_45 = arith.constant 0 : index
    %49 = vector.load %arg5[%c8, %c0_44, %c0_45] : memref<9x8x4xf32, #tpu.memory_space<vmem>>, vector<1x8x4xf32>
    %50 = vector.shape_cast %49 : vector<1x8x4xf32> to vector<8x4xf32>
    %c0_46 = arith.constant 0 : index
    %c38 = arith.constant 38 : index
    %51 = vector.load %arg13[%c0_46, %c38] : memref<4x342xf32, #tpu.memory_space<vmem>>, vector<4x288xf32>
    %cst_47 = arith.constant dense<0.000000e+00> : vector<8x288xf32>
    %52 = tpu.matmul %50, %51, %cst_47 {dimension_numbers = #tpu.dot_dimension_numbers<[1], [0], [0], [1], [0, 0, 1, 1], [], []>} : vector<8x4xf32>, vector<4x288xf32>, vector<8x288xf32> -> vector<8x288xf32>
    %53 = arith.addf %48, %52 : vector<8x288xf32>
    %c0_48 = arith.constant 0 : index
    %c0_49 = arith.constant 0 : index
    %54 = vector.load %arg12[%c0_48, %c0_49] : memref<8x2xf32, #tpu.memory_space<vmem>>, vector<8x1xf32>
    %55 = vector.broadcast %54 : vector<8x1xf32> to vector<8x288xf32>
    %56 = arith.mulf %53, %55 : vector<8x288xf32>
    %c0_50 = arith.constant 0 : index
    %c0_51 = arith.constant 0 : index
    %c0_52 = arith.constant 0 : index
    %c0_53 = arith.constant 0 : index
    %57 = vector.load %arg4[%c0_50, %c0_51, %c0_52, %c0_53] : memref<2x1x1x288xf32, #tpu.memory_space<vmem>>, vector<1x1x1x288xf32>
    %58 = vector.shape_cast %57 : vector<1x1x1x288xf32> to vector<1x288xf32>
    %59 = vector.broadcast %3 : f32 to vector<1x288xf32>
    %60 = arith.mulf %59, %58 : vector<1x288xf32>
    %61 = vector.broadcast %60 : vector<1x288xf32> to vector<8x288xf32>
    %62 = arith.addf %56, %61 : vector<8x288xf32>
    %c0_54 = arith.constant 0 : index
    %c0_55 = arith.constant 0 : index
    %63 = vector.load %arg8[%c0_54, %c0_55] : memref<8x1xf32, #tpu.memory_space<vmem>>, vector<8x1xf32>
    %64 = vector.broadcast %63 : vector<8x1xf32> to vector<8x288xf32>
    %65 = arith.addf %62, %64 : vector<8x288xf32>
    %cst_56 = arith.constant 0.000000e+00 : f32
    %66 = vector.broadcast %cst_56 : f32 to vector<8x288xf32>
    %67 = arith.cmpf oge, %65, %66 : vector<8x288xf32>
    %cst_57 = arith.constant 2.000000e-01 : f32
    %68 = vector.broadcast %cst_57 : f32 to vector<8x288xf32>
    %69 = arith.mulf %68, %65 : vector<8x288xf32>
    %70 = arith.select %67, %65, %69 : vector<8x288xi1>, vector<8x288xf32>
    %cst_58 = arith.constant 1.41421354 : f32
    %71 = vector.broadcast %cst_58 : f32 to vector<8x288xf32>
    %72 = arith.mulf %70, %71 : vector<8x288xf32>
    %c0_59 = arith.constant 0 : index
    %c0_60 = arith.constant 0 : index
    %c0_61 = arith.constant 0 : index
    %73 = vector.load %arg10[%c0_59, %c0_60, %c0_61] : memref<2x8x288xf32, #tpu.memory_space<vmem>>, vector<1x8x288xf32>
    %74 = vector.shape_cast %73 : vector<1x8x288xf32> to vector<8x288xf32>
    %75 = vector.shape_cast %72 : vector<8x288xf32> to vector<1x8x288xf32>
    tpu.vector_store %arg10[%c0_59, %c0_60, %c0_61], %75 {strides = array<i32>} : memref<2x8x288xf32, #tpu.memory_space<vmem>>, vector<1x8x288xf32>,
    %c1_62 = arith.constant 1 : index
    %c0_63 = arith.constant 0 : index
    %c0_64 = arith.constant 0 : index
    %c0_65 = arith.constant 0 : index
    %76 = vector.load %arg2[%c1_62, %c0_63, %c0_64, %c0_65] : memref<2x1x4x342xf32, #tpu.memory_space<vmem>>, vector<1x1x4x342xf32>
    %77 = vector.shape_cast %76 : vector<1x1x4x342xf32> to vector<4x342xf32>
    %c0_66 = arith.constant 0 : index
    %c1_67 = arith.constant 1 : index
    %78 = vector.load %arg11[%c0_66, %c1_67] : memref<4x2xf32, #tpu.memory_space<vmem>>, vector<4x1xf32>
    %79 = vector.broadcast %78 : vector<4x1xf32> to vector<4x342xf32>
    %80 = arith.mulf %77, %79 : vector<4x342xf32>
    %c0_68 = arith.constant 0 : index
    %c0_69 = arith.constant 0 : index
    %81 = vector.load %arg13[%c0_68, %c0_69] : memref<4x342xf32, #tpu.memory_space<vmem>>, vector<4x342xf32>
    tpu.vector_store %arg13[%c0_68, %c0_69], %80 {strides = array<i32>} : memref<4x342xf32, #tpu.memory_space<vmem>>, vector<4x342xf32>,
    %c0_70 = arith.constant 0 : index
    %c0_71 = arith.constant 0 : index
    %c0_72 = arith.constant 0 : index
    %82 = vector.load %arg5[%c0_70, %c0_71, %c0_72] : memref<9x8x4xf32, #tpu.memory_space<vmem>>, vector<1x8x4xf32>
    %83 = vector.shape_cast %82 : vector<1x8x4xf32> to vector<8x4xf32>
    %c0_73 = arith.constant 0 : index
    %c0_74 = arith.constant 0 : index
    %84 = vector.load %arg13[%c0_73, %c0_74] : memref<4x342xf32, #tpu.memory_space<vmem>>, vector<4x288xf32>
    %cst_75 = arith.constant dense<0.000000e+00> : vector<8x288xf32>
    %85 = tpu.matmul %83, %84, %cst_75 {dimension_numbers = #tpu.dot_dimension_numbers<[1], [0], [0], [1], [0, 0, 1, 1], [], []>} : vector<8x4xf32>, vector<4x288xf32>, vector<8x288xf32> -> vector<8x288xf32>
    %c1_76 = arith.constant 1 : index
    %c0_77 = arith.constant 0 : index
    %c0_78 = arith.constant 0 : index
    %86 = vector.load %arg5[%c1_76, %c0_77, %c0_78] : memref<9x8x4xf32, #tpu.memory_space<vmem>>, vector<1x8x4xf32>
    %87 = vector.shape_cast %86 : vector<1x8x4xf32> to vector<8x4xf32>
    %c0_79 = arith.constant 0 : index
    %c1_80 = arith.constant 1 : index
    %88 = vector.load %arg13[%c0_79, %c1_80] : memref<4x342xf32, #tpu.memory_space<vmem>>, vector<4x288xf32>
    %cst_81 = arith.constant dense<0.000000e+00> : vector<8x288xf32>
    %89 = tpu.matmul %87, %88, %cst_81 {dimension_numbers = #tpu.dot_dimension_numbers<[1], [0], [0], [1], [0, 0, 1, 1], [], []>} : vector<8x4xf32>, vector<4x288xf32>, vector<8x288xf32> -> vector<8x288xf32>
    %90 = arith.addf %85, %89 : vector<8x288xf32>
    %c2_82 = arith.constant 2 : index
    %c0_83 = arith.constant 0 : index
    %c0_84 = arith.constant 0 : index
    %91 = vector.load %arg5[%c2_82, %c0_83, %c0_84] : memref<9x8x4xf32, #tpu.memory_space<vmem>>, vector<1x8x4xf32>
    %92 = vector.shape_cast %91 : vector<1x8x4xf32> to vector<8x4xf32>
    %c0_85 = arith.constant 0 : index
    %c2_86 = arith.constant 2 : index
    %93 = vector.load %arg13[%c0_85, %c2_86] : memref<4x342xf32, #tpu.memory_space<vmem>>, vector<4x288xf32>
    %cst_87 = arith.constant dense<0.000000e+00> : vector<8x288xf32>
    %94 = tpu.matmul %92, %93, %cst_87 {dimension_numbers = #tpu.dot_dimension_numbers<[1], [0], [0], [1], [0, 0, 1, 1], [], []>} : vector<8x4xf32>, vector<4x288xf32>, vector<8x288xf32> -> vector<8x288xf32>
    %95 = arith.addf %90, %94 : vector<8x288xf32>
    %c3_88 = arith.constant 3 : index
    %c0_89 = arith.constant 0 : index
    %c0_90 = arith.constant 0 : index
    %96 = vector.load %arg5[%c3_88, %c0_89, %c0_90] : memref<9x8x4xf32, #tpu.memory_space<vmem>>, vector<1x8x4xf32>
    %97 = vector.shape_cast %96 : vector<1x8x4xf32> to vector<8x4xf32>
    %c0_91 = arith.constant 0 : index
    %c18_92 = arith.constant 18 : index
    %98 = vector.load %arg13[%c0_91, %c18_92] : memref<4x342xf32, #tpu.memory_space<vmem>>, vector<4x288xf32>
    %cst_93 = arith.constant dense<0.000000e+00> : vector<8x288xf32>
    %99 = tpu.matmul %97, %98, %cst_93 {dimension_numbers = #tpu.dot_dimension_numbers<[1], [0], [0], [1], [0, 0, 1, 1], [], []>} : vector<8x4xf32>, vector<4x288xf32>, vector<8x288xf32> -> vector<8x288xf32>
    %100 = arith.addf %95, %99 : vector<8x288xf32>
    %c4_94 = arith.constant 4 : index
    %c0_95 = arith.constant 0 : index
    %c0_96 = arith.constant 0 : index
    %101 = vector.load %arg5[%c4_94, %c0_95, %c0_96] : memref<9x8x4xf32, #tpu.memory_space<vmem>>, vector<1x8x4xf32>
    %102 = vector.shape_cast %101 : vector<1x8x4xf32> to vector<8x4xf32>
    %c0_97 = arith.constant 0 : index
    %c19_98 = arith.constant 19 : index
    %103 = vector.load %arg13[%c0_97, %c19_98] : memref<4x342xf32, #tpu.memory_space<vmem>>, vector<4x288xf32>
    %cst_99 = arith.constant dense<0.000000e+00> : vector<8x288xf32>
    %104 = tpu.matmul %102, %103, %cst_99 {dimension_numbers = #tpu.dot_dimension_numbers<[1], [0], [0], [1], [0, 0, 1, 1], [], []>} : vector<8x4xf32>, vector<4x288xf32>, vector<8x288xf32> -> vector<8x288xf32>
    %105 = arith.addf %100, %104 : vector<8x288xf32>
    %c5_100 = arith.constant 5 : index
    %c0_101 = arith.constant 0 : index
    %c0_102 = arith.constant 0 : index
    %106 = vector.load %arg5[%c5_100, %c0_101, %c0_102] : memref<9x8x4xf32, #tpu.memory_space<vmem>>, vector<1x8x4xf32>
    %107 = vector.shape_cast %106 : vector<1x8x4xf32> to vector<8x4xf32>
    %c0_103 = arith.constant 0 : index
    %c20_104 = arith.constant 20 : index
    %108 = vector.load %arg13[%c0_103, %c20_104] : memref<4x342xf32, #tpu.memory_space<vmem>>, vector<4x288xf32>
    %cst_105 = arith.constant dense<0.000000e+00> : vector<8x288xf32>
    %109 = tpu.matmul %107, %108, %cst_105 {dimension_numbers = #tpu.dot_dimension_numbers<[1], [0], [0], [1], [0, 0, 1, 1], [], []>} : vector<8x4xf32>, vector<4x288xf32>, vector<8x288xf32> -> vector<8x288xf32>
    %110 = arith.addf %105, %109 : vector<8x288xf32>
    %c6_106 = arith.constant 6 : index
    %c0_107 = arith.constant 0 : index
    %c0_108 = arith.constant 0 : index
    %111 = vector.load %arg5[%c6_106, %c0_107, %c0_108] : memref<9x8x4xf32, #tpu.memory_space<vmem>>, vector<1x8x4xf32>
    %112 = vector.shape_cast %111 : vector<1x8x4xf32> to vector<8x4xf32>
    %c0_109 = arith.constant 0 : index
    %c36_110 = arith.constant 36 : index
    %113 = vector.load %arg13[%c0_109, %c36_110] : memref<4x342xf32, #tpu.memory_space<vmem>>, vector<4x288xf32>
    %cst_111 = arith.constant dense<0.000000e+00> : vector<8x288xf32>
    %114 = tpu.matmul %112, %113, %cst_111 {dimension_numbers = #tpu.dot_dimension_numbers<[1], [0], [0], [1], [0, 0, 1, 1], [], []>} : vector<8x4xf32>, vector<4x288xf32>, vector<8x288xf32> -> vector<8x288xf32>
    %115 = arith.addf %110, %114 : vector<8x288xf32>
    %c7_112 = arith.constant 7 : index
    %c0_113 = arith.constant 0 : index
    %c0_114 = arith.constant 0 : index
    %116 = vector.load %arg5[%c7_112, %c0_113, %c0_114] : memref<9x8x4xf32, #tpu.memory_space<vmem>>, vector<1x8x4xf32>
    %117 = vector.shape_cast %116 : vector<1x8x4xf32> to vector<8x4xf32>
    %c0_115 = arith.constant 0 : index
    %c37_116 = arith.constant 37 : index
    %118 = vector.load %arg13[%c0_115, %c37_116] : memref<4x342xf32, #tpu.memory_space<vmem>>, vector<4x288xf32>
    %cst_117 = arith.constant dense<0.000000e+00> : vector<8x288xf32>
    %119 = tpu.matmul %117, %118, %cst_117 {dimension_numbers = #tpu.dot_dimension_numbers<[1], [0], [0], [1], [0, 0, 1, 1], [], []>} : vector<8x4xf32>, vector<4x288xf32>, vector<8x288xf32> -> vector<8x288xf32>
    %120 = arith.addf %115, %119 : vector<8x288xf32>
    %c8_118 = arith.constant 8 : index
    %c0_119 = arith.constant 0 : index
    %c0_120 = arith.constant 0 : index
    %121 = vector.load %arg5[%c8_118, %c0_119, %c0_120] : memref<9x8x4xf32, #tpu.memory_space<vmem>>, vector<1x8x4xf32>
    %122 = vector.shape_cast %121 : vector<1x8x4xf32> to vector<8x4xf32>
    %c0_121 = arith.constant 0 : index
    %c38_122 = arith.constant 38 : index
    %123 = vector.load %arg13[%c0_121, %c38_122] : memref<4x342xf32, #tpu.memory_space<vmem>>, vector<4x288xf32>
    %cst_123 = arith.constant dense<0.000000e+00> : vector<8x288xf32>
    %124 = tpu.matmul %122, %123, %cst_123 {dimension_numbers = #tpu.dot_dimension_numbers<[1], [0], [0], [1], [0, 0, 1, 1], [], []>} : vector<8x4xf32>, vector<4x288xf32>, vector<8x288xf32> -> vector<8x288xf32>
    %125 = arith.addf %120, %124 : vector<8x288xf32>
    %c0_124 = arith.constant 0 : index
    %c1_125 = arith.constant 1 : index
    %126 = vector.load %arg12[%c0_124, %c1_125] : memref<8x2xf32, #tpu.memory_space<vmem>>, vector<8x1xf32>
    %127 = vector.broadcast %126 : vector<8x1xf32> to vector<8x288xf32>
    %128 = arith.mulf %125, %127 : vector<8x288xf32>
    %c1_126 = arith.constant 1 : index
    %c0_127 = arith.constant 0 : index
    %c0_128 = arith.constant 0 : index
    %c0_129 = arith.constant 0 : index
    %129 = vector.load %arg4[%c1_126, %c0_127, %c0_128, %c0_129] : memref<2x1x1x288xf32, #tpu.memory_space<vmem>>, vector<1x1x1x288xf32>
    %130 = vector.shape_cast %129 : vector<1x1x1x288xf32> to vector<1x288xf32>
    %131 = vector.broadcast %3 : f32 to vector<1x288xf32>
    %132 = arith.mulf %131, %130 : vector<1x288xf32>
    %133 = vector.broadcast %132 : vector<1x288xf32> to vector<8x288xf32>
    %134 = arith.addf %128, %133 : vector<8x288xf32>
    %c0_130 = arith.constant 0 : index
    %c0_131 = arith.constant 0 : index
    %135 = vector.load %arg8[%c0_130, %c0_131] : memref<8x1xf32, #tpu.memory_space<vmem>>, vector<8x1xf32>
    %136 = vector.broadcast %135 : vector<8x1xf32> to vector<8x288xf32>
    %137 = arith.addf %134, %136 : vector<8x288xf32>
    %cst_132 = arith.constant 0.000000e+00 : f32
    %138 = vector.broadcast %cst_132 : f32 to vector<8x288xf32>
    %139 = arith.cmpf oge, %137, %138 : vector<8x288xf32>
    %cst_133 = arith.constant 2.000000e-01 : f32
    %140 = vector.broadcast %cst_133 : f32 to vector<8x288xf32>
    %141 = arith.mulf %140, %137 : vector<8x288xf32>
    %142 = arith.select %139, %137, %141 : vector<8x288xi1>, vector<8x288xf32>
    %cst_134 = arith.constant 1.41421354 : f32
    %143 = vector.broadcast %cst_134 : f32 to vector<8x288xf32>
    %144 = arith.mulf %142, %143 : vector<8x288xf32>
    %c1_135 = arith.constant 1 : index
    %c0_136 = arith.constant 0 : index
    %c0_137 = arith.constant 0 : index
    %145 = vector.load %arg10[%c1_135, %c0_136, %c0_137] : memref<2x8x288xf32, #tpu.memory_space<vmem>>, vector<1x8x288xf32>
    %146 = vector.shape_cast %145 : vector<1x8x288xf32> to vector<8x288xf32>
    %147 = vector.shape_cast %144 : vector<8x288xf32> to vector<1x8x288xf32>
    tpu.vector_store %arg10[%c1_135, %c0_136, %c0_137], %147 {strides = array<i32>} : memref<2x8x288xf32, #tpu.memory_space<vmem>>, vector<1x8x288xf32>,
    return
  }
  func.func @transform_0(%arg0: i32, %arg1: i32) -> (i32, i32, i32, i32) {
    %c0_i32 = arith.constant 0 : i32
    %c0_i32_0 = arith.constant 0 : i32
    %c0_i32_1 = arith.constant 0 : i32
    return %arg0, %arg1, %c0_i32, %c0_i32_0 : i32, i32, i32, i32
  }
  func.func @transform_1(%arg0: i32, %arg1: i32) -> (i32, i32, i32) {
    %c0_i32 = arith.constant 0 : i32
    %c0_i32_0 = arith.constant 0 : i32
    %c0_i32_1 = arith.constant 0 : i32
    return %arg0, %c0_i32, %c0_i32_0 : i32, i32, i32
  }
  func.func @transform_2(%arg0: i32, %arg1: i32) -> (i32, i32, i32, i32) {
    %c0_i32 = arith.constant 0 : i32
    %c0_i32_0 = arith.constant 0 : i32
    %c0_i32_1 = arith.constant 0 : i32
    return %arg0, %arg1, %c0_i32, %c0_i32_0 : i32, i32, i32, i32
  }
  func.func @transform_3(%arg0: i32, %arg1: i32) -> (i32, i32, i32) {
    %c0_i32 = arith.constant 0 : i32
    %c0_i32_0 = arith.constant 0 : i32
    %c0_i32_1 = arith.constant 0 : i32
    %c0_i32_2 = arith.constant 0 : i32
    return %c0_i32, %c0_i32_0, %c0_i32_1 : i32, i32, i32
  }
  func.func @transform_4(%arg0: i32, %arg1: i32) -> (i32, i32) {
    %c0_i32 = arith.constant 0 : i32
    %c0_i32_0 = arith.constant 0 : i32
    %c0_i32_1 = arith.constant 0 : i32
    return %c0_i32, %c0_i32_0 : i32, i32
  }
  func.func @transform_5(%arg0: i32, %arg1: i32) -> (i32, i32) {
    %c0_i32 = arith.constant 0 : i32
    %c0_i32_0 = arith.constant 0 : i32
    %c0_i32_1 = arith.constant 0 : i32
    return %c0_i32, %c0_i32_0 : i32, i32
  }
  func.func @transform_6(%arg0: i32, %arg1: i32) -> (i32, i32) {
    %c0_i32 = arith.constant 0 : i32
    %c0_i32_0 = arith.constant 0 : i32
    %c0_i32_1 = arith.constant 0 : i32
    return %c0_i32, %c0_i32_0 : i32, i32
  }
  func.func @transform_7(%arg0: i32, %arg1: i32) -> i32 {
    %c0_i32 = arith.constant 0 : i32
    %c0_i32_0 = arith.constant 0 : i32
    return %c0_i32 : i32
  }
  func.func @transform_8(%arg0: i32, %arg1: i32) -> (i32, i32, i32) {
    %c0_i32 = arith.constant 0 : i32
    %c0_i32_0 = arith.constant 0 : i32
    return %arg0, %c0_i32, %arg1 : i32, i32, i32
  }
}

</mosaic_0001>

<bundles_post_ra>
// kernel: tpu_custom_call.1
= control target key start
LH: loop header
LB: loop body
LE: loop exit
PB: predicated region body
PF: predicated region fallthrough
CT: control target
= control target key end

     0   :  { %v2099_v2 = vmov 0   ;;  %s2567_s0 = inlined_call_operand.vmem [shape: f32[2,1,4,342], index: 0, kind: input, shape index: {}]   ;;  %s2568_s1 = inlined_call_operand.vmem [shape: f32[2,1,32], index: 1, kind: input, shape index: {}]   ;;  %s2569_s2 = inlined_call_operand.vmem [shape: f32[2,1,1,288], index: 2, kind: input, shape index: {}]   ;;  %s2570_s3 = inlined_call_operand.vmem [shape: f32[9,8,4], index: 3, kind: input, shape index: {}]   ;;  %s2571_s4 = inlined_call_operand.vmem [shape: f32[4,32], index: 4, kind: input, shape index: {}]   ;;  %s2572_s5 = inlined_call_operand.vmem [shape: f32[4,1], index: 5, kind: input, shape index: {}]   ;;  %s2573_s6 = inlined_call_operand.vmem [shape: f32[8,1], index: 6, kind: input, shape index: {}]   ;;  %s2574_s7 = inlined_call_operand.<no memory space> [shape: f32[1], index: 7, kind: input, shape index: {}]   ;;  %s2575_s8 = inlined_call_operand.hbm [shape: f32[2,8,288], index: 8, kind: output, shape index: {}]  }
   0x1   :  { %v35_v0 = vld [vmem:[%s2568_s1] sm:$0x1]  ;;  %v36_v1 = vld [vmem:[%s2568_s1 + $0x1] sm:$0x1]  ;;  %2068 = vset.pattern.permute.xlu0 %v2099_v2  ;;  %2070 = vset.pattern.permute.xlu2 %v2099_v2 }
   0x2   :  { %40 = vst [vmem:[#allocation1] ss:$9 sm:$0xff] %v35_v0  ;;  %v71_v3 = vld [vmem:[%s2572_s5] sm:$0xf] }
   0x3   :  { %42 = vst [vmem:[#allocation1 + $0x1] ss:$9 sm:$0xff] %v36_v1  ;;  %74 = vperm.xlu0 %2068, %v71_v3  }
   0x4   :  { %14 = vsyncpa [#allocation7], 0  ;;  %vm44_vm0 = vcmask 261120   ;;  %v37_v5 = vld [vmem:[%s2571_s4] sm:$0xf]  ;;  %v2100_v6 = vmov 1  }
   0x5   :  { %2069 = vset.pattern.permute.xlu1 %v2100_v6  ;;  %vm78_vm1 = vcmask 11264   ;;  %vm120_vm2 = vcmask 1043456   ;;  %v2176_v14 = vld [vmem:[%s2570_s3] sm:$0xff]  ;;  %v2181_v15 = vld [vmem:[%s2570_s3 + $0x8] sm:$0xff]  ;;  %v2190_v18 = vld [vmem:[%s2570_s3 + $0x10] sm:$0xff]  ;;  %vm98_vm3 = vcmask 31744  }
   0x6   :  { %v89_v16 = vmul.f32 %v2176_v14, %v2176_v14  ;;  %v90_v17 = vmul.f32 %v2181_v15, %v2181_v15  ;;  %v91_v19 = vmul.f32 %v2190_v18, %v2190_v18  ;;  %v2199_v22 = vld [vmem:[%s2570_s3 + $0x18] sm:$0xff]  ;;  %v2207_v26 = vld [vmem:[%s2570_s3 + $0x20] sm:$0xff]  ;;  %v2215_v30 = vld [vmem:[%s2570_s3 + $0x28] sm:$0xff]  ;;  %v2101_v49 = vmov 839922192   ;;  %s2102_s1 = smov 127  }
   0x7   :  { %v92_v24 = vmul.f32 %v2199_v22, %v2199_v22  ;;  %v93_v28 = vmul.f32 %v2207_v26, %v2207_v26  ;;  %v94_v32 = vmul.f32 %v2215_v30, %v2215_v30  ;;  %v2223_v34 = vld [vmem:[%s2570_s3 + $0x30] sm:$0xff]  ;;  %v2231_v38 = vld [vmem:[%s2570_s3 + $0x38] sm:$0xff]  ;;  %v2239_v42 = vld [vmem:[%s2570_s3 + $0x40] sm:$0xff]  ;;  %v165_v50 = vunpack.c.l.s4 %v2101_v49  ;;  %s2104_s4 = smov 110   ;;  %s2105_s5 = smov 109  }
   0x8   :  { %v99_v20 = vsel %vm98_vm3, %v89_v16, 0.0  ;;  %v100_v21 = vsel %vm98_vm3, %v90_v17, 0.0  ;;  %v102_v25 = vsel %vm98_vm3, %v91_v19, 0.0  ;;  %v95_v36 = vmul.f32 %v2223_v34, %v2223_v34  ;;  %v1989_v52 = vld [vmem:[%s2567_s0 + $0xc] sm:$0xff]  ;;  %v157_v54 = vld [vmem:[%s2567_s0] sm:$0xff]  ;;  %s2106_s13 = smov 108  }
   0x9   :  { %v101_v23 = vadd.f32 %v100_v21, %v99_v20  ;;  %v104_v29 = vsel %vm98_vm3, %v92_v24, 0.0  ;;  %v106_v33 = vsel %vm98_vm3, %v93_v28, 0.0  ;;  %v108_v37 = vsel %vm98_vm3, %v94_v32, 0.0  ;;  %v158_v55 = vld [vmem:[%s2567_s0 + $0x8] sm:$0xf]  ;;  %s2107_s14 = smov 92  }
   0xa   :  { %v43_v4 = vld [vmem:[#allocation1] sm:$0xff]  ;;  %v96_v40 = vmul.f32 %v2231_v38, %v2231_v38  ;;  %v110_v41 = vsel %vm98_vm3, %v95_v36, 0.0  ;;  %v97_v44 = vmul.f32 %v2239_v42, %v2239_v42  ;;  %v166_v51 = vunpack.c.0.s8 %v165_v50  ;;  %v1990_v62 = vld [vmem:[%s2567_s0 + $0x14] sm:$0xf]  ;;  %s2103_s0 = smov 126   ;;  %s2108_s15 = smov 91  }
   0xb   :  { %1923 = vmatpush.xpose.msk.msra.mxu0 %vm44_vm0, %v43_v4  ;;  %v103_v27 = vadd.f32 %v102_v25, %v101_v23  ;;  %vm172_vm4 = vcmask 699392   ;;  %s2109_s16 = smov 90   ;;  %vm193_vm5 = vcmask 1039360   ;;  %vm154_vm9 = vcmask 15360   ;;  %s1911_s3 = sshll.u32 %s2575_s8, 4  ;;  %s1912_s3 = int_to_ptr.hbm [resolvable:$true] %s1911_s3 }
   0xc   :  { %v112_v45 = vsel %vm98_vm3, %v96_v40, 0.0  ;;  %v114_v47 = vsel %vm98_vm3, %v97_v44, 0.0  ;;  %vm360_vm10 = vcmask 1031168   ;;  %vm453_vm11 = vcmask 900096   ;;  %s2111_s30 = smov 384   ;;  %s2112_s9 = smov 24  }
   0xd   :  { %v105_v31 = vadd.f32 %v104_v29, %v103_v27  ;;  %vm546_vm12 = vcmask 891904   ;;  %vm639_vm13 = vcmask 883712   ;;  %vm732_vm14 = vcmask 752640  }
   0xe   :  { %1924 = vmatmul.msk.f32.vlgmr.msra.gmra.mxu0 %vm44_vm0, %v37_v5  ;;  %vm825_vm15 = vcmask 744448  }
   0xf   :  { %v107_v35 = vadd.f32 %v106_v33, %v105_v31 }
  0x11   :  { %v109_v39 = vadd.f32 %v108_v37, %v107_v35 }
  0x13   :  { %v111_v43 = vadd.f32 %v110_v41, %v109_v39 }
  0x15   :  { %v113_v46 = vadd.f32 %v112_v45, %v111_v43 }
  0x17   :  { %v115_v48 = vadd.f32 %v114_v47, %v113_v46 }
  0x75   :  { %v75_v8 = vpop.permute.xlu0 %74 }
  0x8b   :  { %v67_v7 = vpop.f32.mrf.mxu0 }
  0x8c   :  { %v70_v9 = vmul.f32 0.17677669, %v67_v7 }
  0x8e   :  { %v77_v10 = vadd.f32 %v75_v8, %v70_v9 }
  0x90   :  { %79 = vst.msk [vmem:[#allocation2] sm:$0xf] %vm78_vm1, %v77_v10  ;;  %v116_v11 = vmul.f32 %v77_v10, %v77_v10  ;;  %vm918_vm1 = vcmask 736256  }
  0x92   :  { %1925 = vmatpush.msk.msra.mxu1 %vm120_vm2, %v116_v11 }
  0x93   :  { %1926 = vmatmul.msk.f32.vlgmr.msra.gmra.mxu1 %vm98_vm3, %v115_v48 }
  0x97   :  { %v1043_v12 = vld [vmem:[#allocation2] sm:$0xf] }
  0x98   :  { %v159_v13 = vld [vmem:[#allocation2] sm:$0xf]  ;;  %1046 = vperm.xlu1 %2069, %v1043_v12  }
  0x99   :  { %162 = vperm.xlu0 %2068, %v159_v13  }
 0x10a   :  { %v1047_v53 = vpop.permute.xlu1 %1046 }
 0x10b   :  { %v163_v56 = vpop.permute.xlu0 %162  ;;  %v1051_v57 = vperm.slane %v1047_v53, %v166_v51 }
 0x10c   :  { %v167_v58 = vperm.slane %v163_v56, %v166_v51 }
 0x10d   :  { %v2255_v59 = vmul.f32 %v1989_v52, %v1051_v57  ;;  %v1054_v5 = vmul.f32 %v1990_v62, %v1051_v57 }
 0x10e   :  { %v2257_v60 = vmul.f32 %v167_v58, %v157_v54  ;;  %v170_v61 = vmul.f32 %v167_v58, %v158_v55 }
 0x110   :  { %173 = vst.msk [vmem:[#allocation4 + $0x8] sm:$0xf] %vm172_vm4, %v170_v61  ;;  %v141_v54 = vpop.f32.mrf.mxu1 }
 0x111   :  { %181 = vst [vmem:[#allocation1] ss:$2 sm:$0xff] %v2257_v60  ;;  %v142_v55 = vadd.f32 1e-08, %v141_v54 }
 0x113   :  { %2071 = vrsqrt.f32 %v142_v55  ;;  %vm150_vm6 = vweird.f32 %v142_v55 }
 0x117   :  { %v176_v63 = vld [vmem:[#allocation4 + $0x8] sm:$0xf] }
 0x118   :  { %v345_v0 = vld [vmem:[#allocation4 + $0x8] sm:$0xf]  ;;  %183 = vst [vmem:[#allocation1 + $0x10] ss:$2 sm:$0xff] %v176_v63 }
 0x119   :  { %v438_v1 = vld [vmem:[#allocation4 + $0x8] sm:$0xf]  ;;  %v184_v2 = vld.sshfl [vmem:[#allocation1] sm:$0xff pattern:$0x75316420]  ;;  %v2072_v62 = vpop.eup %2071 }
 0x11a   :  { %v185_v3 = vld.sshfl [vmem:[#allocation1 + $0x8] sm:$0xff pattern:$0x75316420]  ;;  %v531_v4 = vld [vmem:[#allocation4 + $0x8] sm:$0xf]  ;;  %187 = vrot.lane.b32.xlu1 %v184_v2, %s2102_s1  ;;  %vm151_vm7 = vweird.f32 %v2072_v62 }
 0x11b   :  { %267 = vst [vmem:[#allocation1] ss:$2 sm:$0xff] %v2257_v60  ;;  %v624_v6 = vld [vmem:[#allocation4 + $0x8] sm:$0xf]  ;;  %189 = vrot.lane.b32.xlu2 %v185_v3, %s2102_s1  ;;  %vm152_vm8 = vmor %vm150_vm6, %vm151_vm7 }
 0x11c   :  { %v717_v7 = vld [vmem:[#allocation4 + $0x8] sm:$0xf] }
 0x11d   :  { %v810_v8 = vld [vmem:[#allocation4 + $0x8] sm:$0xf] }
 0x11e   :  { %v2267_v9 = vld [vmem:[#allocation4 + $0x8] sm:$0xf] }
 0x11f   :  { %1056 = vst.msk [vmem:[#allocation4 + $0x8] sm:$0xf] %vm172_vm4, %v1054_v5  ;;  %v186_v10 = vld.sshfl [vmem:[#allocation1 + $0x10] sm:$0xff pattern:$0x75316420] }
 0x120   :  { %269 = vst [vmem:[#allocation1 + $0x10] ss:$2 sm:$0xff] %v176_v63  ;;  %v145_v63 = vmul.f32 %v2072_v62, %v142_v55 }
 0x122   :  { %v2270_v11 = vld.sshfl [vmem:[#allocation1] sm:$0xff pattern:$0x75316420]  ;;  %v2272_v12 = vld.sshfl [vmem:[#allocation1 + $0x8] sm:$0xff pattern:$0x75316420]  ;;  %v146_v2 = vmul.f32 %v2072_v62, %v145_v63 }
 0x123   :  { %348 = vst [vmem:[#allocation1] ss:$2 sm:$0xff] %v2257_v60  ;;  %191 = vrot.lane.b32.xlu2 %v186_v10, %s2102_s1 }
 0x124   :  { %v147_v5 = vmul.f32 0.5, %v146_v2 }
 0x126   :  { %v1059_v43 = vld [vmem:[#allocation4 + $0x8] sm:$0xf] }
 0x127   :  { %v272_v13 = vld.sshfl [vmem:[#allocation1 + $0x10] sm:$0xff pattern:$0x75316420]  ;;  %v1223_v50 = vld [vmem:[#allocation4 + $0x8] sm:$0xf] }
 0x128   :  { %350 = vst [vmem:[#allocation1 + $0x10] ss:$2 sm:$0xff] %v345_v0  ;;  %1938 = vmatpush.msk.msrb.mxu0 %vm120_vm2, %v272_v13  ;;  %v1314_v57 = vld [vmem:[#allocation4 + $0x8] sm:$0xf] }
 0x129   :  { %1939 = vmatmul.msk.f32.vlgmr.msrb.gmra.mxu0 %vm98_vm3, %v2176_v14  ;;  %v1405_v3 = vld [vmem:[#allocation4 + $0x8] sm:$0xf] }
 0x12a   :  { %v351_v16 = vld.sshfl [vmem:[#allocation1] sm:$0xff pattern:$0x75316420]  ;;  %v352_v17 = vld.sshfl [vmem:[#allocation1 + $0x8] sm:$0xff pattern:$0x75316420] }
 0x12b   :  { %441 = vst [vmem:[#allocation1] ss:$2 sm:$0xff] %v2257_v60  ;;  %356 = vrot.lane.b32.xlu0 %v352_v17, %s2103_s0  ;;  %354 = vrot.lane.b32.xlu2 %v351_v16, %s2103_s0 }
 0x12f   :  { %v353_v19 = vld.sshfl [vmem:[#allocation1 + $0x10] sm:$0xff pattern:$0x75316420] }
 0x130   :  { %443 = vst [vmem:[#allocation1 + $0x10] ss:$2 sm:$0xff] %v438_v1  ;;  %358 = vrot.lane.b32.xlu1 %v353_v19, %s2103_s0 }
 0x132   :  { %v445_v20 = vld.sshfl [vmem:[#allocation1 + $0x8] sm:$0xff pattern:$0x75316420]  ;;  %v444_v21 = vld.sshfl [vmem:[#allocation1] sm:$0xff pattern:$0x75316420] }
 0x133   :  { %447 = vrot.lane.b32.xlu0 %v444_v21, %s2104_s4  ;;  %534 = vst [vmem:[#allocation1] ss:$2 sm:$0xff] %v2257_v60 }
 0x137   :  { %v446_v23 = vld.sshfl [vmem:[#allocation1 + $0x10] sm:$0xff pattern:$0x75316420] }
 0x138   :  { %536 = vst [vmem:[#allocation1 + $0x10] ss:$2 sm:$0xff] %v531_v4  ;;  %449 = vrot.lane.b32.xlu1 %v445_v20, %s2104_s4 }
 0x13a   :  { %v538_v24 = vld.sshfl [vmem:[#allocation1 + $0x8] sm:$0xff pattern:$0x75316420]  ;;  %v537_v25 = vld.sshfl [vmem:[#allocation1] sm:$0xff pattern:$0x75316420] }
 0x13b   :  { %542 = vrot.lane.b32.xlu0 %v538_v24, %s2105_s5  ;;  %540 = vrot.lane.b32.xlu2 %v537_v25, %s2105_s5  ;;  %627 = vst [vmem:[#allocation1] ss:$2 sm:$0xff] %v2257_v60 }
 0x13f   :  { %v539_v27 = vld.sshfl [vmem:[#allocation1 + $0x10] sm:$0xff pattern:$0x75316420] }
 0x140   :  { %451 = vrot.lane.b32.xlu1 %v446_v23, %s2104_s4  ;;  %629 = vst [vmem:[#allocation1 + $0x10] ss:$2 sm:$0xff] %v624_v6  ;;  %v1587_v23 = vld [vmem:[#allocation4 + $0x8] sm:$0xf] }
 0x142   :  { %v631_v28 = vld.sshfl [vmem:[#allocation1 + $0x8] sm:$0xff pattern:$0x75316420]  ;;  %v630_v29 = vld.sshfl [vmem:[#allocation1] sm:$0xff pattern:$0x75316420] }
 0x143   :  { %544 = vrot.lane.b32.xlu2 %v539_v27, %s2105_s5  ;;  %633 = vrot.lane.b32.xlu0 %v630_v29, %s2106_s13  ;;  %720 = vst [vmem:[#allocation1] ss:$2 sm:$0xff] %v2257_v60  ;;  %v1678_v29 = vld [vmem:[#allocation4 + $0x8] sm:$0xf] }
 0x147   :  { %v632_v31 = vld.sshfl [vmem:[#allocation1 + $0x10] sm:$0xff pattern:$0x75316420] }
 0x148   :  { %635 = vrot.lane.b32.xlu1 %v631_v28, %s2106_s13  ;;  %722 = vst [vmem:[#allocation1 + $0x10] ss:$2 sm:$0xff] %v717_v7 }
 0x14a   :  { %v724_v32 = vld.sshfl [vmem:[#allocation1 + $0x8] sm:$0xff pattern:$0x75316420]  ;;  %v723_v33 = vld.sshfl [vmem:[#allocation1] sm:$0xff pattern:$0x75316420] }
 0x14b   :  { %637 = vrot.lane.b32.xlu2 %v632_v31, %s2106_s13  ;;  %728 = vrot.lane.b32.xlu0 %v724_v32, %s2107_s14  ;;  %813 = vst [vmem:[#allocation1] ss:$2 sm:$0xff] %v2257_v60 }
 0x14f   :  { %v725_v35 = vld.sshfl [vmem:[#allocation1 + $0x10] sm:$0xff pattern:$0x75316420] }
 0x150   :  { %730 = vrot.lane.b32.xlu1 %v725_v35, %s2107_s14  ;;  %815 = vst [vmem:[#allocation1 + $0x10] ss:$2 sm:$0xff] %v810_v8  ;;  %v148_v8 = vsub.f32 1.5, %v147_v5 }
 0x152   :  { %v817_v36 = vld.sshfl [vmem:[#allocation1 + $0x8] sm:$0xff pattern:$0x75316420]  ;;  %v816_v37 = vld.sshfl [vmem:[#allocation1] sm:$0xff pattern:$0x75316420] }
 0x153   :  { %726 = vrot.lane.b32.xlu2 %v723_v33, %s2107_s14  ;;  %819 = vrot.lane.b32.xlu0 %v816_v37, %s2108_s15  ;;  %906 = vst [vmem:[#allocation1] ss:$2 sm:$0xff] %v2257_v60  ;;  %v1769_v37 = vld [vmem:[#allocation4 + $0x8] sm:$0xf] }
 0x157   :  { %v818_v39 = vld.sshfl [vmem:[#allocation1 + $0x10] sm:$0xff pattern:$0x75316420] }
 0x158   :  { %821 = vrot.lane.b32.xlu1 %v817_v36, %s2108_s15  ;;  %908 = vst [vmem:[#allocation1 + $0x10] ss:$2 sm:$0xff] %v2267_v9  ;;  %v149_v9 = vmul.f32 %v2072_v62, %v148_v8 }
 0x15a   :  { %v910_v40 = vld.sshfl [vmem:[#allocation1 + $0x8] sm:$0xff pattern:$0x75316420]  ;;  %v909_v41 = vld.sshfl [vmem:[#allocation1] sm:$0xff pattern:$0x75316420]  ;;  %v153_v10 = vsel %vm152_vm8, %v2072_v62, %v149_v9 }
 0x15b   :  { %914 = vrot.lane.b32.xlu0 %v910_v40, %s2109_s16  ;;  %912 = vrot.lane.b32.xlu2 %v909_v41, %s2109_s16  ;;  %1063 = vst [vmem:[#allocation1] ss:$2 sm:$0xff] %v2255_v59 }
 0x15c   :  { %155 = vst.msk [vmem:[#allocation3] sm:$0xff] %vm154_vm9, %v153_v10 }
 0x15f   :  { %v911_v44 = vld.sshfl [vmem:[#allocation1 + $0x10] sm:$0xff pattern:$0x75316420] }
 0x160   :  { %823 = vrot.lane.b32.xlu1 %v818_v39, %s2108_s15  ;;  %1065 = vst [vmem:[#allocation1 + $0x10] ss:$2 sm:$0xff] %v1059_v43 }
 0x162   :  { %v1067_v45 = vld.sshfl [vmem:[#allocation1 + $0x8] sm:$0xff pattern:$0x75316420]  ;;  %v1066_v46 = vld.sshfl [vmem:[#allocation1] sm:$0xff pattern:$0x75316420] }
 0x163   :  { %916 = vrot.lane.b32.xlu2 %v911_v44, %s2109_s16  ;;  %1069 = vrot.lane.b32.xlu0 %v1066_v46, %s2102_s1  ;;  %1146 = vst [vmem:[#allocation1] ss:$2 sm:$0xff] %v2255_v59  ;;  %v1858_v46 = vld [vmem:[#allocation3] sm:$0xff] }
 0x167   :  { %v1068_v47 = vld.sshfl [vmem:[#allocation1 + $0x10] sm:$0xff pattern:$0x75316420] }
 0x168   :  { %1071 = vrot.lane.b32.xlu1 %v1067_v45, %s2102_s1  ;;  %1148 = vst [vmem:[#allocation1 + $0x10] ss:$2 sm:$0xff] %v1059_v43 }
 0x16a   :  { %v2311_v48 = vld.sshfl [vmem:[#allocation1] sm:$0xff pattern:$0x75316420]  ;;  %v2313_v49 = vld.sshfl [vmem:[#allocation1 + $0x8] sm:$0xff pattern:$0x75316420] }
 0x16b   :  { %1226 = vst [vmem:[#allocation1] ss:$2 sm:$0xff] %v2255_v59  ;;  %1073 = vrot.lane.b32.xlu2 %v1068_v47, %s2102_s1 }
 0x16f   :  { %v2317_v51 = vld.sshfl [vmem:[#allocation1 + $0x10] sm:$0xff pattern:$0x75316420] }
 0x170   :  { %1228 = vst [vmem:[#allocation1 + $0x10] ss:$2 sm:$0xff] %v1223_v50 }
 0x172   :  { %v1230_v52 = vld.sshfl [vmem:[#allocation1 + $0x8] sm:$0xff pattern:$0x75316420]  ;;  %v1229_v53 = vld.sshfl [vmem:[#allocation1] sm:$0xff pattern:$0x75316420] }
 0x173   :  { %1234 = vrot.lane.b32.xlu1 %v1230_v52, %s2103_s0  ;;  %1232 = vrot.lane.b32.xlu0 %v1229_v53, %s2103_s0  ;;  %1317 = vst [vmem:[#allocation1] ss:$2 sm:$0xff] %v2255_v59 }
 0x175   :  { %v190_v56 = vpop.permute.xlu2 %189 }
 0x177   :  { %v1231_v58 = vld.sshfl [vmem:[#allocation1 + $0x10] sm:$0xff pattern:$0x75316420] }
 0x178   :  { %1319 = vst [vmem:[#allocation1 + $0x10] ss:$2 sm:$0xff] %v1314_v57  ;;  %v1880_v57 = vld [vmem:[%s2573_s6] sm:$0xff] }
 0x17a   :  { %v1321_v60 = vld.sshfl [vmem:[#allocation1 + $0x8] sm:$0xff pattern:$0x75316420]  ;;  %v1320_v61 = vld.sshfl [vmem:[#allocation1] sm:$0xff pattern:$0x75316420] }
 0x17b   :  { %1236 = vrot.lane.b32.xlu1 %v1231_v58, %s2103_s0  ;;  %1325 = vrot.lane.b32.xlu0 %v1321_v60, %s2104_s4  ;;  %1408 = vst [vmem:[#allocation1] ss:$2 sm:$0xff] %v2255_v59 }
 0x17c   :  { %1323 = vrot.lane.b32.xlu2 %v1320_v61, %s2104_s4 }
 0x17d   :  { %v192_v0 = vpop.permute.xlu2 %191 }
 0x17e   :  { %1932 = vmatpush.msk.msrb.mxu1 %vm120_vm2, %v192_v0  ;;  %v195_v1 = vsel %vm193_vm5, %v190_v56, %v192_v0 }
 0x17f   :  { %1930 = vmatpush.msk.msra.mxu3 %vm120_vm2, %v195_v1  ;;  %1933 = vmatmul.msk.f32.vlgmr.msrb.gmra.mxu1 %vm98_vm3, %v2181_v15  ;;  %v1322_v4 = vld.sshfl [vmem:[#allocation1 + $0x10] sm:$0xff pattern:$0x75316420] }
 0x180   :  { %1410 = vst [vmem:[#allocation1 + $0x10] ss:$2 sm:$0xff] %v1405_v3  ;;  %1931 = vmatmul.msk.f32.vlgmr.msra.gmra.mxu3 %vm98_vm3, %v2181_v15 }
 0x181   :  { %1936 = vmatpush.msk.msrb.mxu3 %vm120_vm2, %v2272_v12  ;;  %v1496_v12 = vld [vmem:[#allocation4 + $0x8] sm:$0xf] }
 0x182   :  { %v1412_v6 = vld.sshfl [vmem:[#allocation1 + $0x8] sm:$0xff pattern:$0x75316420]  ;;  %v1411_v7 = vld.sshfl [vmem:[#allocation1] sm:$0xff pattern:$0x75316420] }
 0x183   :  { %1416 = vrot.lane.b32.xlu1 %v1412_v6, %s2105_s5  ;;  %1414 = vrot.lane.b32.xlu0 %v1411_v7, %s2105_s5  ;;  %1499 = vst [vmem:[#allocation1] ss:$2 sm:$0xff] %v2255_v59 }
 0x184   :  { %1327 = vrot.lane.b32.xlu2 %v1322_v4, %s2104_s4 }
 0x185   :  { %v355_v20 = vpop.permute.xlu2 %354 }
 0x187   :  { %v1413_v13 = vld.sshfl [vmem:[#allocation1 + $0x10] sm:$0xff pattern:$0x75316420] }
 0x188   :  { %1501 = vst [vmem:[#allocation1 + $0x10] ss:$2 sm:$0xff] %v1496_v12  ;;  %1937 = vmatmul.msk.f32.vlgmr.msrb.gmra.mxu3 %vm98_vm3, %v2176_v14 }
 0x18a   :  { %v1503_v16 = vld.sshfl [vmem:[#allocation1 + $0x8] sm:$0xff pattern:$0x75316420]  ;;  %v1502_v17 = vld.sshfl [vmem:[#allocation1] sm:$0xff pattern:$0x75316420] }
 0x18b   :  { %1507 = vrot.lane.b32.xlu0 %v1503_v16, %s2106_s13  ;;  %1590 = vst [vmem:[#allocation1] ss:$2 sm:$0xff] %v2255_v59 }
 0x18c   :  { %1418 = vrot.lane.b32.xlu2 %v1413_v13, %s2105_s5  ;;  %v188_v19 = vpop.permute.xlu1 %187 }
 0x18d   :  { %v194_v21 = vsel %vm193_vm5, %v188_v19, %v190_v56 }
 0x18e   :  { %1928 = vmatpush.msk.msra.mxu2 %vm120_vm2, %v194_v21 }
 0x18f   :  { %v1504_v24 = vld.sshfl [vmem:[#allocation1 + $0x10] sm:$0xff pattern:$0x75316420]  ;;  %1929 = vmatmul.msk.f32.vlgmr.msra.gmra.mxu2 %vm98_vm3, %v2181_v15 }
 0x190   :  { %1934 = vmatpush.msk.msrb.mxu2 %vm120_vm2, %v2270_v11  ;;  %1509 = vrot.lane.b32.xlu1 %v1504_v24, %s2106_s13  ;;  %1592 = vst [vmem:[#allocation1 + $0x10] ss:$2 sm:$0xff] %v1587_v23 }
 0x192   :  { %v1594_v25 = vld.sshfl [vmem:[#allocation1 + $0x8] sm:$0xff pattern:$0x75316420]  ;;  %v1593_v27 = vld.sshfl [vmem:[#allocation1] sm:$0xff pattern:$0x75316420] }
 0x193   :  { %1596 = vrot.lane.b32.xlu0 %v1593_v27, %s2107_s14  ;;  %1681 = vst [vmem:[#allocation1] ss:$2 sm:$0xff] %v2255_v59 }
 0x194   :  { %1505 = vrot.lane.b32.xlu2 %v1502_v17, %s2106_s13 }
 0x195   :  { %v541_v28 = vpop.permute.xlu2 %540 }
 0x197   :  { %v1595_v31 = vld.sshfl [vmem:[#allocation1 + $0x10] sm:$0xff pattern:$0x75316420]  ;;  %1935 = vmatmul.msk.f32.vlgmr.msrb.gmra.mxu2 %vm98_vm3, %v2176_v14 }
 0x198   :  { %1598 = vrot.lane.b32.xlu1 %v1594_v25, %s2107_s14  ;;  %1683 = vst [vmem:[#allocation1 + $0x10] ss:$2 sm:$0xff] %v1678_v29 }
 0x19a   :  { %v1685_v11 = vld.sshfl [vmem:[#allocation1 + $0x8] sm:$0xff pattern:$0x75316420]  ;;  %v1684_v32 = vld.sshfl [vmem:[#allocation1] sm:$0xff pattern:$0x75316420] }
 0x19b   :  { %1689 = vrot.lane.b32.xlu0 %v1685_v11, %s2108_s15  ;;  %1772 = vst [vmem:[#allocation1] ss:$2 sm:$0xff] %v2255_v59 }
 0x19c   :  { %1687 = vrot.lane.b32.xlu2 %v1684_v32, %s2108_s15 }
 0x19d   :  { %v357_v33 = vpop.permute.xlu0 %356  ;;  %v545_v35 = vpop.permute.xlu2 %544 }
 0x19e   :  { %v361_v36 = vsel %vm360_vm10, %v355_v20, %v357_v33 }
 0x19f   :  { %1941 = vmatpush.msk.msra.mxu1 %vm120_vm2, %v361_v36  ;;  %v1686_v39 = vld.sshfl [vmem:[#allocation1 + $0x10] sm:$0xff pattern:$0x75316420] }
 0x1a0   :  { %1942 = vmatmul.msk.f32.vlgmr.msra.gmra.mxu1 %vm98_vm3, %v2190_v18  ;;  %1600 = vrot.lane.b32.xlu1 %v1595_v31, %s2107_s14  ;;  %1774 = vst [vmem:[#allocation1 + $0x10] ss:$2 sm:$0xff] %v1769_v37 }
 0x1a2   :  { %v1775_v40 = vld.sshfl [vmem:[#allocation1] sm:$0xff pattern:$0x75316420]  ;;  %v359_v41 = vpop.permute.xlu1 %358  ;;  %v1776_v45 = vld.sshfl [vmem:[#allocation1 + $0x8] sm:$0xff pattern:$0x75316420] }
 0x1a3   :  { %1778 = vrot.lane.b32.xlu0 %v1775_v40, %s2109_s16  ;;  %v362_v59 = vsel %vm360_vm10, %v357_v33, %v359_v41  ;;  %1945 = vmatpush.msk.msra.mxu3 %vm120_vm2, %v359_v41 }
 0x1a4   :  { %1691 = vrot.lane.b32.xlu2 %v1686_v39, %s2108_s15  ;;  %1943 = vmatpush.msk.msra.mxu2 %vm120_vm2, %v362_v59 }
 0x1a5   :  { %v448_v43 = vpop.permute.xlu0 %447  ;;  %1946 = vmatmul.msk.f32.vlgmr.msra.gmra.mxu3 %vm98_vm3, %v2190_v18  ;;  %v638_v44 = vpop.permute.xlu2 %637  ;;  %1944 = vmatmul.msk.f32.vlgmr.msra.gmra.mxu2 %vm98_vm3, %v2190_v18 }
 0x1a7   :  { %v1777_v47 = vld.sshfl [vmem:[#allocation1 + $0x10] sm:$0xff pattern:$0x75316420] }
 0x1a8   :  { %1780 = vrot.lane.b32.xlu1 %v1776_v45, %s2109_s16 }
 0x1aa   :  { %v450_v50 = vpop.permute.xlu1 %449 }
 0x1ab   :  { %996 = vperm.xlu0 %2068, %v1858_v46   ;;  %v454_v52 = vsel %vm453_vm11, %v448_v43, %v450_v50 }
 0x1ac   :  { %1782 = vrot.lane.b32.xlu2 %v1777_v47, %s2109_s16  ;;  %1948 = vmatpush.msk.msra.mxu0 %vm120_vm2, %v454_v52 }
 0x1ad   :  { %v543_v53 = vpop.permute.xlu0 %542  ;;  %1949 = vmatmul.msk.f32.vlgmr.msra.gmra.mxu0 %vm98_vm3, %v2199_v22  ;;  %v727_v56 = vpop.permute.xlu2 %726 }
 0x1ae   :  { %v547_v54 = vsel %vm546_vm12, %v541_v28, %v543_v53  ;;  %v548_v55 = vsel %vm546_vm12, %v543_v53, %v545_v35 }
 0x1af   :  { %1955 = vmatpush.msk.msrb.mxu3 %vm120_vm2, %v547_v54  ;;  %1957 = vmatpush.msk.msrb.mxu0 %vm120_vm2, %v548_v55 }
 0x1b0   :  { %1956 = vmatmul.msk.f32.vlgmr.msrb.gmra.mxu3 %vm98_vm3, %v2207_v26  ;;  %1861 = vperm.xlu1 %2069, %v1858_v46  }
 0x1b1   :  { %1966 = vmatpush.msk.msra.mxu0 %vm120_vm2, %v638_v44 }
 0x1b2   :  { %v452_v58 = vpop.permute.xlu1 %451 }
 0x1b3   :  { %1883 = vperm.xlu0 %2068, %v1880_v57   ;;  %v455_v60 = vsel %vm453_vm11, %v450_v50, %v452_v58  ;;  %1952 = vmatpush.msk.msrb.mxu2 %vm120_vm2, %v452_v58 }
 0x1b4   :  { %1018 = vperm.xlu2 %2070, %v1880_v57   ;;  %1950 = vmatpush.msk.msrb.mxu1 %vm120_vm2, %v455_v60  ;;  %v339_v60 = vpop.f32.mrf.mxu0 }
 0x1b5   :  { %1953 = vmatmul.msk.f32.vlgmr.msrb.gmra.mxu2 %vm98_vm3, %v2199_v22  ;;  %v634_v61 = vpop.permute.xlu0 %633  ;;  %1958 = vmatmul.msk.f32.vlgmr.msrb.gmra.mxu0 %vm98_vm3, %v2207_v26  ;;  %v913_v62 = vpop.permute.xlu2 %912 }
 0x1b6   :  { %1959 = vmatpush.msk.msra.mxu1 %vm120_vm2, %v545_v35 }
 0x1b7   :  { %1951 = vmatmul.msk.f32.vlgmr.msrb.gmra.mxu1 %vm98_vm3, %v2199_v22 }
 0x1ba   :  { %v636_v63 = vpop.permute.xlu1 %635 }
 0x1bb   :  { %v641_v0 = vsel %vm639_vm13, %v636_v63, %v638_v44  ;;  %v640_v1 = vsel %vm639_vm13, %v634_v61, %v636_v63 }
 0x1bc   :  { %1962 = vmatpush.msk.msra.mxu2 %vm120_vm2, %v640_v1  ;;  %1964 = vmatpush.msk.msra.mxu3 %vm120_vm2, %v641_v0 }
 0x1bd   :  { %v729_v2 = vpop.permute.xlu0 %728  ;;  %1963 = vmatmul.msk.f32.vlgmr.msra.gmra.mxu2 %vm98_vm3, %v2215_v30  ;;  %1965 = vmatmul.msk.f32.vlgmr.msra.gmra.mxu3 %vm98_vm3, %v2215_v30  ;;  %v917_v6 = vpop.permute.xlu2 %916 }
 0x1be   :  { %v733_v3 = vsel %vm732_vm14, %v727_v56, %v729_v2  ;;  %1967 = vmatmul.msk.f32.vlgmr.msra.gmra.mxu0 %vm98_vm3, %v2215_v30 }
 0x1bf   :  { %1960 = vmatmul.msk.f32.vlgmr.msra.gmra.mxu1 %vm98_vm3, %v2207_v26 }
 0x1c0   :  { %1969 = vmatpush.msk.msrb.mxu1 %vm120_vm2, %v733_v3 }
 0x1c2   :  { %v731_v4 = vpop.permute.xlu1 %730 }
 0x1c3   :  { %v734_v5 = vsel %vm732_vm14, %v729_v2, %v731_v4  ;;  %1973 = vmatpush.msk.msrb.mxu3 %vm120_vm2, %v731_v4 }
 0x1c4   :  { %1971 = vmatpush.msk.msrb.mxu2 %vm120_vm2, %v734_v5 }
 0x1c5   :  { %v820_v7 = vpop.permute.xlu0 %819  ;;  %1972 = vmatmul.msk.f32.vlgmr.msrb.gmra.mxu2 %vm98_vm3, %v2223_v34  ;;  %1974 = vmatmul.msk.f32.vlgmr.msrb.gmra.mxu3 %vm98_vm3, %v2223_v34  ;;  %v1074_v12 = vpop.permute.xlu2 %1073 }
 0x1c7   :  { %1970 = vmatmul.msk.f32.vlgmr.msrb.gmra.mxu1 %vm98_vm3, %v2223_v34 }
 0x1ca   :  { %v822_v8 = vpop.permute.xlu1 %821 }
 0x1cb   :  { %v826_v9 = vsel %vm825_vm15, %v820_v7, %v822_v8 }
 0x1cc   :  { %1976 = vmatpush.msk.msrb.mxu0 %vm120_vm2, %v826_v9 }
 0x1cd   :  { %v915_v10 = vpop.permute.xlu0 %914  ;;  %1977 = vmatmul.msk.f32.vlgmr.msrb.gmra.mxu0 %vm98_vm3, %v2231_v38 }
 0x1ce   :  { %v919_v13 = vsel %vm918_vm1, %v913_v62, %v915_v10  ;;  %v920_v16 = vsel %vm918_vm1, %v915_v10, %v917_v6 }
 0x1cf   :  { %1983 = vmatpush.msk.msra.mxu3 %vm120_vm2, %v919_v13  ;;  %1985 = vmatpush.msk.msra.mxu0 %vm120_vm2, %v920_v16 }
 0x1d0   :  { %1984 = vmatmul.msk.f32.vlgmr.msra.gmra.mxu3 %vm98_vm3, %v2239_v42 }
 0x1d1   :  { %1996 = vmatpush.msk.msrb.mxu0 %vm120_vm2, %v1074_v12 }
 0x1d2   :  { %v824_v17 = vpop.permute.xlu1 %823 }
 0x1d3   :  { %v827_v19 = vsel %vm825_vm15, %v822_v8, %v824_v17  ;;  %1980 = vmatpush.msk.msra.mxu2 %vm120_vm2, %v824_v17 }
 0x1d4   :  { %1978 = vmatpush.msk.msra.mxu1 %vm120_vm2, %v827_v19  ;;  %1981 = vmatmul.msk.f32.vlgmr.msra.gmra.mxu2 %vm98_vm3, %v2231_v38 }
 0x1d5   :  { %1979 = vmatmul.msk.f32.vlgmr.msra.gmra.mxu1 %vm98_vm3, %v2231_v38  ;;  %1986 = vmatmul.msk.f32.vlgmr.msra.gmra.mxu0 %vm98_vm3, %v2239_v42  ;;  %v1070_v23 = vpop.permute.xlu0 %1069 }
 0x1d6   :  { %v1324_v20 = vpop.permute.xlu2 %1323  ;;  %1987 = vmatpush.msk.msrb.mxu1 %vm120_vm2, %v917_v6 }
 0x1d8   :  { %1998 = vmatpush.msk.msra.mxu1 %vm120_vm2, %v2311_v48 }
 0x1da   :  { %v1072_v21 = vpop.permute.xlu1 %1071 }
 0x1db   :  { %v1076_v24 = vsel %vm193_vm5, %v1072_v21, %v1074_v12  ;;  %v1075_v25 = vsel %vm193_vm5, %v1070_v23, %v1072_v21 }
 0x1dc   :  { %1992 = vmatpush.msk.msrb.mxu2 %vm120_vm2, %v1075_v25  ;;  %1994 = vmatpush.msk.msrb.mxu3 %vm120_vm2, %v1076_v24 }
 0x1dd   :  { %1988 = vmatmul.msk.f32.vlgmr.msrb.gmra.mxu1 %vm98_vm3, %v2239_v42  ;;  %1993 = vmatmul.msk.f32.vlgmr.msrb.gmra.mxu2 %vm98_vm3, %v2181_v15 }
 0x1de   :  { %2000 = vmatpush.msk.msra.mxu2 %vm120_vm2, %v2313_v49  ;;  %v1328_v27 = vpop.permute.xlu2 %1327  ;;  %2002 = vmatpush.msk.msra.mxu3 %vm120_vm2, %v2317_v51 }
 0x1df   :  { %1995 = vmatmul.msk.f32.vlgmr.msrb.gmra.mxu3 %vm98_vm3, %v2181_v15  ;;  %1997 = vmatmul.msk.f32.vlgmr.msrb.gmra.mxu0 %vm98_vm3, %v2181_v15 }
 0x1e5   :  { %v1235_v48 = vpop.permute.xlu1 %1234  ;;  %v1233_v28 = vpop.permute.xlu0 %1232  ;;  %1999 = vmatmul.msk.f32.vlgmr.msra.gmra.mxu1 %vm98_vm3, %v2176_v14  ;;  %2001 = vmatmul.msk.f32.vlgmr.msra.gmra.mxu2 %vm98_vm3, %v2176_v14 }
 0x1e6   :  { %v1238_v29 = vsel %vm360_vm10, %v1233_v28, %v1235_v48  ;;  %v1419_v49 = vpop.permute.xlu2 %1418 }
 0x1e7   :  { %2005 = vmatpush.msk.msra.mxu0 %vm120_vm2, %v1238_v29  ;;  %2003 = vmatmul.msk.f32.vlgmr.msra.gmra.mxu3 %vm98_vm3, %v2176_v14  ;;  %v1002_v29 = vld [vmem:[%s2569_s2] sm:$0x7] }
 0x1e8   :  { %2006 = vmatmul.msk.f32.vlgmr.msra.gmra.mxu0 %vm98_vm3, %v2190_v18 }
 0x1ed   :  { %v1237_v15 = vpop.permute.xlu1 %1236  ;;  %v1326_v51 = vpop.permute.xlu0 %1325 }
 0x1ee   :  { %v1239_v31 = vsel %vm360_vm10, %v1235_v48, %v1237_v15  ;;  %v1329_v11 = vsel %vm453_vm11, %v1324_v20, %v1326_v51  ;;  %v1330_v32 = vsel %vm453_vm11, %v1326_v51, %v1328_v27  ;;  %2009 = vmatpush.msk.msrb.mxu2 %vm120_vm2, %v1237_v15  ;;  %v1506_v14 = vpop.permute.xlu2 %1505 }
 0x1ef   :  { %2007 = vmatpush.msk.msrb.mxu1 %vm120_vm2, %v1239_v31  ;;  %2012 = vmatpush.msk.msrb.mxu3 %vm120_vm2, %v1329_v11 }
 0x1f0   :  { %2014 = vmatpush.msk.msrb.mxu0 %vm120_vm2, %v1330_v32  ;;  %2008 = vmatmul.msk.f32.vlgmr.msrb.gmra.mxu1 %vm98_vm3, %v2190_v18 }
 0x1f1   :  { %2010 = vmatmul.msk.f32.vlgmr.msrb.gmra.mxu2 %vm98_vm3, %v2190_v18  ;;  %2013 = vmatmul.msk.f32.vlgmr.msrb.gmra.mxu3 %vm98_vm3, %v2199_v22 }
 0x1f2   :  { %2016 = vmatpush.msk.msra.mxu1 %vm120_vm2, %v1328_v27  ;;  %2023 = vmatpush.msk.msra.mxu0 %vm120_vm2, %v1419_v49 }
 0x1f3   :  { %2015 = vmatmul.msk.f32.vlgmr.msrb.gmra.mxu0 %vm98_vm3, %v2199_v22 }
 0x1f5   :  { %v1417_v33 = vpop.permute.xlu1 %1416  ;;  %v1415_v35 = vpop.permute.xlu0 %1414 }
 0x1f6   :  { %v1421_v36 = vsel %vm546_vm12, %v1417_v33, %v1419_v49  ;;  %v1420_v37 = vsel %vm546_vm12, %v1415_v35, %v1417_v33  ;;  %v1688_v18 = vpop.permute.xlu2 %1687  ;;  %v1003_v49 = vstv %s2574_s7 }
 0x1f7   :  { %2019 = vmatpush.msk.msra.mxu2 %vm120_vm2, %v1420_v37  ;;  %2021 = vmatpush.msk.msra.mxu3 %vm120_vm2, %v1421_v36  ;;  %v1004_v32 = vmul.f32 %v1003_v49, %v1002_v29 }
 0x1f8   :  { %2017 = vmatmul.msk.f32.vlgmr.msra.gmra.mxu1 %vm98_vm3, %v2199_v22 }
 0x1f9   :  { %2020 = vmatmul.msk.f32.vlgmr.msra.gmra.mxu2 %vm98_vm3, %v2207_v26  ;;  %2022 = vmatmul.msk.f32.vlgmr.msra.gmra.mxu3 %vm98_vm3, %v2207_v26 }
 0x1fb   :  { %2024 = vmatmul.msk.f32.vlgmr.msra.gmra.mxu0 %vm98_vm3, %v2207_v26 }
 0x1fd   :  { %v1508_v39 = vpop.permute.xlu0 %1507 }
 0x1fe   :  { %v1511_v40 = vsel %vm639_vm13, %v1506_v14, %v1508_v39  ;;  %v1692_v59 = vpop.permute.xlu2 %1691 }
 0x1ff   :  { %2026 = vmatpush.msk.msrb.mxu1 %vm120_vm2, %v1511_v40 }
 0x200   :  { %2027 = vmatmul.msk.f32.vlgmr.msrb.gmra.mxu1 %vm98_vm3, %v2215_v30 }
 0x202   :  { %v1510_v41 = vpop.permute.xlu1 %1509 }
 0x203   :  { %v1512_v22 = vsel %vm639_vm13, %v1508_v39, %v1510_v41  ;;  %2030 = vmatpush.msk.msrb.mxu3 %vm120_vm2, %v1510_v41  ;;  %v244_v53 = vpop.f32.mrf.mxu3  ;;  %v1006_v41 = vperm.slane %v1004_v32, 0 }
 0x204   :  { %2028 = vmatpush.msk.msrb.mxu2 %vm120_vm2, %v1512_v22  ;;  %2031 = vmatmul.msk.f32.vlgmr.msrb.gmra.mxu3 %vm98_vm3, %v2215_v30 }
 0x205   :  { %v1597_v26 = vpop.permute.xlu0 %1596  ;;  %2029 = vmatmul.msk.f32.vlgmr.msrb.gmra.mxu2 %vm98_vm3, %v2215_v30 }
 0x206   :  { %v1783_v50 = vpop.permute.xlu2 %1782 }
 0x20a   :  { %v1599_v43 = vpop.permute.xlu1 %1598 }
 0x20b   :  { %v1602_v44 = vsel %vm732_vm14, %v1597_v26, %v1599_v43  ;;  %v319_v61 = vpop.f32.mrf.mxu3  ;;  %v1007_v26 = vperm.slane %v1004_v32, 1 }
 0x20c   :  { %2033 = vmatpush.msk.msrb.mxu0 %vm120_vm2, %v1602_v44  ;;  %v320_v7 = vadd.f32 %v319_v61, %v244_v53 }
 0x20d   :  { %v1690_v45 = vpop.permute.xlu0 %1689  ;;  %2034 = vmatmul.msk.f32.vlgmr.msrb.gmra.mxu0 %vm98_vm3, %v2223_v34 }
 0x20e   :  { %v1693_v46 = vsel %vm825_vm15, %v1688_v18, %v1690_v45  ;;  %v1694_v47 = vsel %vm825_vm15, %v1690_v45, %v1692_v59 }
 0x20f   :  { %2040 = vmatpush.msk.msra.mxu3 %vm120_vm2, %v1693_v46  ;;  %2042 = vmatpush.msk.msra.mxu0 %vm120_vm2, %v1694_v47  ;;  %v1019_v47 = vpop.permute.xlu2 %1018 }
 0x210   :  { %2041 = vmatmul.msk.f32.vlgmr.msra.gmra.mxu3 %vm98_vm3, %v2231_v38 }
 0x211   :  { %2051 = vmatpush.msk.msrb.mxu0 %vm120_vm2, %v1783_v50 }
 0x212   :  { %v1601_v30 = vpop.permute.xlu1 %1600  ;;  %v224_v58 = vpop.f32.mrf.mxu2 }
 0x213   :  { %v1603_v52 = vsel %vm732_vm14, %v1599_v43, %v1601_v30  ;;  %2037 = vmatpush.msk.msra.mxu2 %vm120_vm2, %v1601_v30 }
 0x214   :  { %2035 = vmatpush.msk.msra.mxu1 %vm120_vm2, %v1603_v52  ;;  %2038 = vmatmul.msk.f32.vlgmr.msra.gmra.mxu2 %vm98_vm3, %v2223_v34 }
 0x215   :  { %2036 = vmatmul.msk.f32.vlgmr.msra.gmra.mxu1 %vm98_vm3, %v2223_v34  ;;  %2043 = vmatmul.msk.f32.vlgmr.msra.gmra.mxu0 %vm98_vm3, %v2231_v38  ;;  %v1779_v55 = vpop.permute.xlu0 %1778  ;;  %v264_v34 = vpop.f32.mrf.mxu1 }
 0x216   :  { %2044 = vmatpush.msk.msrb.mxu1 %vm120_vm2, %v1692_v59  ;;  %v340_v13 = vadd.f32 %v339_v60, %v264_v34 }
 0x21a   :  { %v1781_v54 = vpop.permute.xlu1 %1780  ;;  %v299_v62 = vpop.f32.mrf.mxu2 }
 0x21b   :  { %v1785_v56 = vsel %vm918_vm1, %v1781_v54, %v1783_v50  ;;  %v1784_v57 = vsel %vm918_vm1, %v1779_v55, %v1781_v54  ;;  %v300_v6 = vadd.f32 %v299_v62, %v224_v58 }
 0x21c   :  { %2047 = vmatpush.msk.msrb.mxu2 %vm120_vm2, %v1784_v57  ;;  %2049 = vmatpush.msk.msrb.mxu3 %vm120_vm2, %v1785_v56  ;;  %v1008_v56 = vperm.slane %v1004_v32, 2 }
 0x21d   :  { %2045 = vmatmul.msk.f32.vlgmr.msrb.gmra.mxu1 %vm98_vm3, %v2231_v38  ;;  %2048 = vmatmul.msk.f32.vlgmr.msrb.gmra.mxu2 %vm98_vm3, %v2239_v42  ;;  %v389_v63 = vpop.f32.mrf.mxu1  ;;  %v997_v22 = vpop.permute.xlu0 %996 }
 0x21e   :  { %2050 = vmatmul.msk.f32.vlgmr.msrb.gmra.mxu3 %vm98_vm3, %v2239_v42  ;;  %2052 = vmatmul.msk.f32.vlgmr.msrb.gmra.mxu0 %vm98_vm3, %v2239_v42  ;;  %v432_v9 = vadd.f32 %v389_v63, %v300_v6 }
 0x228   :  { %v429_v1 = vpop.f32.mrf.mxu3  ;;  %v409_v2 = vpop.f32.mrf.mxu2 }
 0x229   :  { %v433_v42 = vadd.f32 %v409_v2, %v320_v7  ;;  %v434_v19 = vadd.f32 %v429_v1, %v340_v13 }
 0x22a   :  { %v482_v0 = vpop.f32.mrf.mxu0 }
 0x22b   :  { %v525_v16 = vadd.f32 %v482_v0, %v432_v9 }
 0x232   :  { %v595_v4 = vpop.f32.mrf.mxu0 }
 0x233   :  { %v575_v38 = vpop.f32.mrf.mxu3 }
 0x234   :  { %v502_v3 = vpop.f32.mrf.mxu1  ;;  %v618_v21 = vadd.f32 %v575_v38, %v525_v16 }
 0x235   :  { %v526_v20 = vadd.f32 %v502_v3, %v433_v42 }
 0x237   :  { %v619_v48 = vadd.f32 %v595_v4, %v526_v20 }
 0x238   :  { %v522_v5 = vpop.f32.mrf.mxu2 }
 0x239   :  { %v527_v24 = vadd.f32 %v522_v5, %v434_v19 }
 0x23b   :  { %v708_v10 = vpop.f32.mrf.mxu0 }
 0x23c   :  { %v615_v8 = vpop.f32.mrf.mxu1 }
 0x23d   :  { %v620_v15 = vadd.f32 %v615_v8, %v527_v24 }
 0x23f   :  { %v713_v33 = vadd.f32 %v708_v10, %v620_v15 }
 0x240   :  { %v688_v12 = vpop.f32.mrf.mxu3  ;;  %v668_v17 = vpop.f32.mrf.mxu2 }
 0x241   :  { %v711_v28 = vadd.f32 %v668_v17, %v618_v21  ;;  %v712_v31 = vadd.f32 %v688_v12, %v619_v48 }
 0x244   :  { %v761_v25 = vpop.f32.mrf.mxu1 }
 0x245   :  { %v804_v11 = vadd.f32 %v761_v25, %v711_v28 }
 0x248   :  { %v801_v23 = vpop.f32.mrf.mxu3  ;;  %v781_v51 = vpop.f32.mrf.mxu2 }
 0x249   :  { %v805_v14 = vadd.f32 %v781_v51, %v712_v31  ;;  %v806_v43 = vadd.f32 %v801_v23, %v713_v33 }
 0x24a   :  { %v854_v27 = vpop.f32.mrf.mxu0 }
 0x24b   :  { %v897_v35 = vadd.f32 %v854_v27, %v804_v11 }
 0x252   :  { %v874_v36 = vpop.f32.mrf.mxu1  ;;  %v967_v37 = vpop.f32.mrf.mxu0 }
 0x253   :  { %v898_v18 = vadd.f32 %v874_v36, %v805_v14  ;;  %v947_v39 = vpop.f32.mrf.mxu3 }
 0x254   :  { %v990_v40 = vadd.f32 %v947_v39, %v897_v35  ;;  %v2053_v39 = vld [vmem:[%s2569_s2 + $0x3] sm:$0x7]  ;;  %s2110_s2 = smov [#allocation6]  }
 0x255   :  { %v991_v59 = vadd.f32 %v967_v37, %v898_v18  ;;  %s1909_s7 = sshll.u32 %s2110_s2, 4  ;;  %s1910_s7 = int_to_ptr.vmem [resolvable:$true] %s1909_s7 }
 0x256   :  { %v999_v44 = vmul.f32 %v997_v22, %v990_v40 }
 0x257   :  { %v1000_v45 = vmul.f32 %v997_v22, %v991_v59  ;;  %v894_v46 = vpop.f32.mrf.mxu2 }
 0x258   :  { %v899_v50 = vadd.f32 %v894_v46, %v806_v43  ;;  %v1012_v30 = vadd.f32 %v1006_v41, %v999_v44  ;;  %v1869_v43 = vmul.f32 %v2053_v39, %v1003_v49 }
 0x259   :  { %v1013_v52 = vadd.f32 %v1007_v26, %v1000_v45 }
 0x25a   :  { %v987_v53 = vpop.f32.mrf.mxu1  ;;  %v1021_v54 = vadd.f32 %v1019_v47, %v1012_v30 }
 0x25b   :  { %v992_v55 = vadd.f32 %v987_v53, %v899_v50  ;;  %v1022_v57 = vadd.f32 %v1019_v47, %v1013_v52 }
 0x25c   :  { %vm1024_vm2 = vcmp.ge.f32.partialorder %v1021_v54, 0.0  ;;  %v1027_v58 = vmul.f32 0.2, %v1021_v54  ;;  %v1143_v4 = vpop.f32.mrf.mxu0 }
 0x25d   :  { %v1001_v34 = vmul.f32 %v997_v22, %v992_v55  ;;  %vm1025_vm3 = vcmp.ge.f32.partialorder %v1022_v57, 0.0  ;;  %v1028_v60 = vmul.f32 0.2, %v1022_v57  ;;  %v1862_v55 = vpop.permute.xlu1 %1861 }
 0x25e   :  { %v1030_v61 = vsel %vm1024_vm2, %v1021_v54, %v1027_v58  ;;  %v1873_v54 = vperm.slane %v1869_v43, 2 }
 0x25f   :  { %v1014_v62 = vadd.f32 %v1008_v56, %v1001_v34  ;;  %v1031_v63 = vsel %vm1025_vm3, %v1022_v57, %v1028_v60  ;;  %v1033_v0 = vmul.f32 1.4142135, %v1030_v61 }
 0x260   :  { %v1034_v1 = vmul.f32 1.4142135, %v1031_v63  ;;  %v1103_v6 = vpop.f32.mrf.mxu2 }
 0x261   :  { %v1023_v2 = vadd.f32 %v1019_v47, %v1014_v62  ;;  %1036 = vst [vmem:[#allocation6] sm:$0xff] %v1033_v0  ;;  %v1871_v62 = vperm.slane %v1869_v43, 0  ;;  %v1884_v0 = vpop.permute.xlu0 %1883 }
 0x262   :  { %1037 = vst [vmem:[#allocation6 + $0x8] sm:$0xff] %v1034_v1  ;;  %v1123_v7 = vpop.f32.mrf.mxu3  ;;  %v1178_v8 = vpop.f32.mrf.mxu1  ;;  %v1872_v1 = vperm.slane %v1869_v43, 1 }
 0x263   :  { %vm1026_vm4 = vcmp.ge.f32.partialorder %v1023_v2, 0.0  ;;  %v1029_v3 = vmul.f32 0.2, %v1023_v2  ;;  %v1179_v28 = vadd.f32 %v1178_v8, %v1103_v6 }
 0x265   :  { %v1032_v38 = vsel %vm1026_vm4, %v1023_v2, %v1029_v3  ;;  %v1266_v9 = vpop.f32.mrf.mxu0 }
 0x266   :  { %v1035_v5 = vmul.f32 1.4142135, %v1032_v38  ;;  %v1309_v11 = vadd.f32 %v1266_v9, %v1179_v28 }
 0x268   :  { %1039 = vst.msk [vmem:[#allocation6 + $0x10] sm:$0xff] %vm44_vm0, %v1035_v5  ;;  %v1198_v10 = vpop.f32.mrf.mxu2 }
 0x269   :  { %v1199_v29 = vadd.f32 %v1198_v10, %v1123_v7 }
 0x26a   :  { %v1218_v12 = vpop.f32.mrf.mxu3 }
 0x26b   :  { %v1219_v24 = vadd.f32 %v1218_v12, %v1143_v4 }
 0x26d   :  { %v1286_v13 = vpop.f32.mrf.mxu1 }
 0x26e   :  { %v1310_v32 = vadd.f32 %v1286_v13, %v1199_v29 }
 0x270   :  { %v1377_v42 = vpop.f32.mrf.mxu0 }
 0x271   :  { %v1401_v37 = vadd.f32 %v1377_v42, %v1310_v32 }
 0x274   :  { %v1306_v16 = vpop.f32.mrf.mxu2  ;;  %v1357_v17 = vpop.f32.mrf.mxu3 }
 0x275   :  { %v1397_v19 = vpop.f32.mrf.mxu1  ;;  %v1311_v48 = vadd.f32 %v1306_v16, %v1219_v24  ;;  %v1400_v36 = vadd.f32 %v1357_v17, %v1309_v11 }
 0x277   :  { %v1402_v31 = vadd.f32 %v1397_v19, %v1311_v48 }
 0x278   :  { %v1488_v20 = vpop.f32.mrf.mxu0 }
 0x279   :  { %v1493_v35 = vadd.f32 %v1488_v20, %v1402_v31 }
 0x27c   :  { %v1448_v21 = vpop.f32.mrf.mxu2  ;;  %v1468_v23 = vpop.f32.mrf.mxu3 }
 0x27d   :  { %v1539_v25 = vpop.f32.mrf.mxu1  ;;  %v1491_v40 = vadd.f32 %v1448_v21, %v1400_v36  ;;  %v1492_v22 = vadd.f32 %v1468_v23, %v1401_v37 }
 0x27f   :  { %v1582_v46 = vadd.f32 %v1539_v25, %v1491_v40 }
 0x287   :  { %v1579_v51 = vpop.f32.mrf.mxu3 }
 0x288   :  { %v1559_v15 = vpop.f32.mrf.mxu2  ;;  %v1584_v18 = vadd.f32 %v1579_v51, %v1493_v35 }
 0x289   :  { %v1583_v44 = vadd.f32 %v1559_v15, %v1492_v22 }
 0x28a   :  { %v1630_v27 = vpop.f32.mrf.mxu0 }
 0x28b   :  { %v1673_v52 = vadd.f32 %v1630_v27, %v1582_v46 }
 0x292   :  { %v1650_v14 = vpop.f32.mrf.mxu1  ;;  %v1741_v33 = vpop.f32.mrf.mxu0 }
 0x293   :  { %v1721_v26 = vpop.f32.mrf.mxu3  ;;  %v1674_v30 = vadd.f32 %v1650_v14, %v1583_v44 }
 0x294   :  { %v1764_v56 = vadd.f32 %v1721_v26, %v1673_v52 }
 0x295   :  { %v1765_v58 = vadd.f32 %v1741_v33, %v1674_v30 }
 0x297   :  { %v1670_v41 = vpop.f32.mrf.mxu2 }
 0x298   :  { %v1675_v59 = vadd.f32 %v1670_v41, %v1584_v18 }
 0x29a   :  { %v1761_v45 = vpop.f32.mrf.mxu1 }
 0x29b   :  { %v1766_v47 = vadd.f32 %v1761_v45, %v1675_v59  ;;  %v1852_v50 = vpop.f32.mrf.mxu0 }
 0x29d   :  { %v1857_v53 = vadd.f32 %v1852_v50, %v1766_v47 }
 0x29f   :  { %v1866_v57 = vmul.f32 %v1862_v55, %v1857_v53 }
 0x2a0   :  { %v1812_v34 = vpop.f32.mrf.mxu2 }
 0x2a1   :  { %v1879_v60 = vadd.f32 %v1873_v54, %v1866_v57  ;;  %v1855_v61 = vadd.f32 %v1812_v34, %v1764_v56  ;;  %v1832_v63 = vpop.f32.mrf.mxu3 }
 0x2a2   :  { %v1856_v49 = vadd.f32 %v1832_v63, %v1765_v58 }
 0x2a3   :  { %v1888_v2 = vadd.f32 %v1884_v0, %v1879_v60  ;;  %v1864_v3 = vmul.f32 %v1862_v55, %v1855_v61 }
 0x2a4   :  { %v1865_v4 = vmul.f32 %v1862_v55, %v1856_v49 }
 0x2a5   :  { %vm1891_vm5 = vcmp.ge.f32.partialorder %v1888_v2, 0.0  ;;  %v1894_v38 = vmul.f32 0.2, %v1888_v2  ;;  %v1877_v5 = vadd.f32 %v1871_v62, %v1864_v3 }
 0x2a6   :  { %v1878_v6 = vadd.f32 %v1872_v1, %v1865_v4 }
 0x2a7   :  { %v1897_v7 = vsel %vm1891_vm5, %v1888_v2, %v1894_v38  ;;  %v1886_v8 = vadd.f32 %v1884_v0, %v1877_v5 }
 0x2a8   :  { %v1900_v9 = vmul.f32 1.4142135, %v1897_v7  ;;  %v1887_v10 = vadd.f32 %v1884_v0, %v1878_v6 }
 0x2a9   :  { %vm1889_vm6 = vcmp.ge.f32.partialorder %v1886_v8, 0.0  ;;  %v1892_v12 = vmul.f32 0.2, %v1886_v8 }
 0x2aa   :  { %1904 = vst.msk [vmem:[#allocation6 + $0x28] sm:$0xff] %vm44_vm0, %v1900_v9  ;;  %vm1890_vm7 = vcmp.ge.f32.partialorder %v1887_v10, 0.0  ;;  %v1893_v13 = vmul.f32 0.2, %v1887_v10 }
 0x2ab   :  { %v1895_v42 = vsel %vm1889_vm6, %v1886_v8, %v1892_v12 }
 0x2ac   :  { %v1898_v16 = vmul.f32 1.4142135, %v1895_v42  ;;  %v1896_v17 = vsel %vm1890_vm7, %v1887_v10, %v1893_v13 }
 0x2ad   :  { %v1899_v19 = vmul.f32 1.4142135, %v1896_v17 }
 0x2ae   :  { %1902 = vst [vmem:[#allocation6 + $0x18] sm:$0xff] %v1898_v16 }
 0x2af   :  { %1903 = vst [vmem:[#allocation6 + $0x20] sm:$0xff] %v1899_v19 }
 0x2b0   :  { %1917 = dma.vmem_to_hbm [thread:$0]  %s1910_s7, 768, %s1912_s3, [#allocation7], %s2111_s30, %s2111_s30, %s2112_s9  }
 0x2b1   :  { %2097 = dma.done.wait [#allocation7], 768  }
 0x2b2   :  { %2098 = vsyncadd [#allocation7], 4294966528 }
 0x2b3   :  { %1922 = vsyncpa [#allocation7], 1 }

</bundles_post_ra>
